<compile_context>
chip_gen: v6e
topology: v6e:2x2x1
jax: 0.10.0
libtpu: 0.0.40
codegen_flags: <defaults>
</compile_context>

<pallas_src>
import jax
import jax.numpy as jnp
from jax import lax
from jax.experimental import pallas as pl
from jax.experimental.pallas import tpu as pltpu

IN_DIM = 1024
HID = 128
OUT_DIM = 1
MAX_B_TILE = 2048   # cap: double-buffered f32 x tile = 16 MiB, fits scoped VMEM
MIN_B_TILE = 256    # full MXU M on v6e/v7x, fine on v5e


def _round_up(n, m):
    return -(-n // m) * m


def _choose_b_tile(batch):
    """Adaptive batch tile: >=2 tiles when possible (both v7x TCs), capped for VMEM."""
    b_ceil = _round_up(batch, MIN_B_TILE)
    half = (b_ceil + 1) // 2
    return min(MAX_B_TILE, max(MIN_B_TILE, _round_up(half, MIN_B_TILE)))


def bandit_mlp_kernel(x_ref, w1_ref, b1_ref, w2_ref, b2_ref, w3_ref, b3_ref, o_ref):
    # x arrives f32 from HBM; cast to bf16 on the VPU (free — kernel is DMA bound).
    x = x_ref[...].astype(jnp.bfloat16)                     # (B_TILE, 1024)

    # fc1 + ReLU  (bf16 MXU, f32 accumulation; bias/ReLU in f32)
    h1 = jnp.dot(x, w1_ref[...], preferred_element_type=jnp.float32)
    h1 = jnp.maximum(h1 + b1_ref[...], 0.0)                 # (B_TILE, HID)

    # fc2 + ReLU
    h2 = jnp.dot(h1.astype(jnp.bfloat16), w2_ref[...],
                 preferred_element_type=jnp.float32)
    h2 = jnp.maximum(h2 + b2_ref[...], 0.0)                 # (B_TILE, HID) f32

    # fc3 (128 -> 1): bf16 trans-B contraction w3 (1,128) x h2^T so the result
    # is a lane-dense (1, B_TILE) row (no masked 1-lane column stores).
    out = lax.dot_general(w3_ref[...], h2.astype(jnp.bfloat16),
                          (((1,), (1,)), ((), ())),
                          preferred_element_type=jnp.float32)   # (1, B_TILE)
    o_ref[0] = (out + b3_ref[0, 0]).astype(o_ref.dtype)


def bandit_network(x, params):
    """x: (B, 1024) float32. params weights in bf16, biases in f32. Returns (B, 1) f32."""
    w1, b1, w2, b2, w3, b3 = params
    B = x.shape[0]
    b_tile = _choose_b_tile(B)
    num_tiles = -(-B // b_tile)   # partial trailing block allowed; no x padding

    resident = lambda shape: pl.BlockSpec(shape, lambda i: (0,) * len(shape))

    out = pl.pallas_call(
        bandit_mlp_kernel,
        out_shape=jax.ShapeDtypeStruct((num_tiles, 1, b_tile), jnp.float32),
        grid_spec=pltpu.PrefetchScalarGridSpec(
            num_scalar_prefetch=0,
            grid=(num_tiles,),
            in_specs=[
                pl.BlockSpec((b_tile, IN_DIM), lambda i: (i, 0)),   # x tile (f32)
                resident((IN_DIM, HID)),                            # w1 bf16 (in, out)
                resident((1, HID)),                                 # b1 f32
                resident((HID, HID)),                               # w2 bf16 (in, out)
                resident((1, HID)),                                 # b2 f32
                resident((1, HID)),                                 # w3 bf16 (out, in)
                pl.BlockSpec(memory_space=pltpu.MemorySpace.SMEM),  # b3 scalar
            ],
            out_specs=pl.BlockSpec((1, 1, b_tile), lambda i: (i, 0, 0)),
        ),
        compiler_params=pltpu.CompilerParams(
            dimension_semantics=("parallel",),   # shard batch tiles across v7x's 2 TCs
            vmem_limit_bytes=48 << 20,           # covers double-buffered f32 2048-row tile
        ),
    )(x, w1, b1, w2, b2, w3, b3)

    return out.reshape(num_tiles * b_tile, OUT_DIM)[:B]


def init_params(key):
    """nn.Linear-style init. Weights stored in bf16 once (no per-call converts);
    w1/w2 in (in, out) layout, w3 kept in PyTorch (out, in) = (1, 128)."""
    ks = jax.random.split(key, 6)

    def uniform(k, shape, fan_in):
        bound = 1.0 / float(fan_in) ** 0.5
        return jax.random.uniform(k, shape, jnp.float32, -bound, bound)

    w1 = uniform(ks[0], (IN_DIM, HID), IN_DIM).astype(jnp.bfloat16)
    b1 = uniform(ks[1], (1, HID), IN_DIM)
    w2 = uniform(ks[2], (HID, HID), HID).astype(jnp.bfloat16)
    b2 = uniform(ks[3], (1, HID), HID)
    w3 = uniform(ks[4], (OUT_DIM, HID), HID).astype(jnp.bfloat16)   # (1, 128)
    b3 = uniform(ks[5], (1, OUT_DIM), HID)                          # (1, 1)
    return (w1, b1, w2, b2, w3, b3)


def reference(x, params):
    """Same math as the kernel (bf16 matmul operands, f32 accumulation) in plain JAX."""
    w1, b1, w2, b2, w3, b3 = params
    h1 = jnp.maximum(jnp.dot(x.astype(jnp.bfloat16), w1,
                             preferred_element_type=jnp.float32) + b1, 0.0)
    h2 = jnp.maximum(jnp.dot(h1.astype(jnp.bfloat16), w2,
                             preferred_element_type=jnp.float32) + b2, 0.0)
    return jnp.dot(h2.astype(jnp.bfloat16), w3.T,
                   preferred_element_type=jnp.float32) + b3


if __name__ == "__main__":
    key = jax.random.PRNGKey(0)
    k_x, k_p = jax.random.split(key)
    params = init_params(k_p)

    # Small batch: single (partial) 256-row tile; rows beyond B are garbage and sliced off.
    B = 4
    x = jax.random.normal(k_x, (B, IN_DIM), jnp.float32)
    out = jax.block_until_ready(bandit_network(x, params))
    ref = reference(x, params)
    assert out.shape == (B, OUT_DIM)
    assert jnp.allclose(out, ref, atol=1e-2, rtol=1e-2), "mismatch vs reference (B=4)"

    # Ragged multi-tile batch: 2 tiles of 512 (last one partial); exercises the
    # 'parallel' grid axis (both v7x TensorCores) and the no-pad boundary block.
    B2 = 520
    x2 = jax.random.normal(k_x, (B2, IN_DIM), jnp.float32)
    out2 = jax.block_until_ready(bandit_network(x2, params))
    ref2 = reference(x2, params)
    assert out2.shape == (B2, OUT_DIM)
    assert jnp.allclose(out2, ref2, atol=1e-2, rtol=1e-2), "mismatch vs reference (B=520)"

    print("KERNEL_OK")
</pallas_src>

<mosaic_0001>
module attributes {stable_mosaic.version = 11 : i64} {
  func.func @bandit_mlp_kernel(%arg0: i32, %arg1: memref<256x1024xf32, #tpu.memory_space<vmem>>, %arg2: memref<1024x128xbf16, #tpu.memory_space<vmem>>, %arg3: memref<1x128xf32, #tpu.memory_space<vmem>>, %arg4: memref<128x128xbf16, #tpu.memory_space<vmem>>, %arg5: memref<1x128xf32, #tpu.memory_space<vmem>>, %arg6: memref<1x128xbf16, #tpu.memory_space<vmem>>, %arg7: memref<1x1xf32, #tpu.memory_space<smem>>, %arg8: memref<1x1x256xf32, #tpu.memory_space<vmem>>) attributes {dimension_semantics = [#tpu.dimension_semantics<parallel>], iteration_bounds = array<i64: 1>, scalar_prefetch = 0 : i64, scratch_operands = 0 : i64, tpu.core_type = #tpu.core_type<tc>, window_params = [{transform_indices = @transform_0, window_bounds = array<i64: 256, 1024>}, {pipeline_mode = #tpu.pipeline_mode<synchronous>, transform_indices = @transform_1, window_bounds = array<i64: 1024, 128>}, {pipeline_mode = #tpu.pipeline_mode<synchronous>, transform_indices = @transform_2, window_bounds = array<i64: 1, 128>}, {pipeline_mode = #tpu.pipeline_mode<synchronous>, transform_indices = @transform_3, window_bounds = array<i64: 128, 128>}, {pipeline_mode = #tpu.pipeline_mode<synchronous>, transform_indices = @transform_4, window_bounds = array<i64: 1, 128>}, {pipeline_mode = #tpu.pipeline_mode<synchronous>, transform_indices = @transform_5, window_bounds = array<i64: 1, 128>}, {transform_indices = @transform_6, window_bounds = array<i64: 1, 1>}, {transform_indices = @transform_7, window_bounds = array<i64: 1, 1, 256>}]} {
    %c0 = arith.constant 0 : index
    %c0_0 = arith.constant 0 : index
    %0 = vector.load %arg1[%c0, %c0_0] : memref<256x1024xf32, #tpu.memory_space<vmem>>, vector<256x1024xf32>
    %1 = arith.truncf %0 : vector<256x1024xf32> to vector<256x1024xbf16>
    %c0_1 = arith.constant 0 : index
    %c0_2 = arith.constant 0 : index
    %2 = vector.load %arg2[%c0_1, %c0_2] : memref<1024x128xbf16, #tpu.memory_space<vmem>>, vector<1024x128xbf16>
    %cst = arith.constant dense<0.000000e+00> : vector<256x128xf32>
    %3 = tpu.matmul %1, %2, %cst {dimension_numbers = #tpu.dot_dimension_numbers<[1], [0], [0], [1], [0, 0, 1, 1], [], []>} : vector<256x1024xbf16>, vector<1024x128xbf16>, vector<256x128xf32> -> vector<256x128xf32>
    %c0_3 = arith.constant 0 : index
    %c0_4 = arith.constant 0 : index
    %4 = vector.load %arg3[%c0_3, %c0_4] : memref<1x128xf32, #tpu.memory_space<vmem>>, vector<1x128xf32>
    %5 = vector.broadcast %4 : vector<1x128xf32> to vector<256x128xf32>
    %6 = arith.addf %3, %5 : vector<256x128xf32>
    %cst_5 = arith.constant 0.000000e+00 : f32
    %7 = vector.broadcast %cst_5 : f32 to vector<256x128xf32>
    %8 = arith.maximumf %6, %7 : vector<256x128xf32>
    %9 = arith.truncf %8 : vector<256x128xf32> to vector<256x128xbf16>
    %c0_6 = arith.constant 0 : index
    %c0_7 = arith.constant 0 : index
    %10 = vector.load %arg4[%c0_6, %c0_7] : memref<128x128xbf16, #tpu.memory_space<vmem>>, vector<128x128xbf16>
    %cst_8 = arith.constant dense<0.000000e+00> : vector<256x128xf32>
    %11 = tpu.matmul %9, %10, %cst_8 {dimension_numbers = #tpu.dot_dimension_numbers<[1], [0], [0], [1], [0, 0, 1, 1], [], []>} : vector<256x128xbf16>, vector<128x128xbf16>, vector<256x128xf32> -> vector<256x128xf32>
    %c0_9 = arith.constant 0 : index
    %c0_10 = arith.constant 0 : index
    %12 = vector.load %arg5[%c0_9, %c0_10] : memref<1x128xf32, #tpu.memory_space<vmem>>, vector<1x128xf32>
    %13 = vector.broadcast %12 : vector<1x128xf32> to vector<256x128xf32>
    %14 = arith.addf %11, %13 : vector<256x128xf32>
    %cst_11 = arith.constant 0.000000e+00 : f32
    %15 = vector.broadcast %cst_11 : f32 to vector<256x128xf32>
    %16 = arith.maximumf %14, %15 : vector<256x128xf32>
    %c0_12 = arith.constant 0 : index
    %c0_13 = arith.constant 0 : index
    %17 = vector.load %arg6[%c0_12, %c0_13] : memref<1x128xbf16, #tpu.memory_space<vmem>>, vector<1x128xbf16>
    %18 = arith.truncf %16 : vector<256x128xf32> to vector<256x128xbf16>
    %cst_14 = arith.constant dense<0.000000e+00> : vector<1x256xf32>
    %19 = tpu.matmul %17, %18, %cst_14 {dimension_numbers = #tpu.dot_dimension_numbers<[1], [1], [0], [0], [0, 0, 1, 0], [], []>} : vector<1x128xbf16>, vector<256x128xbf16>, vector<1x256xf32> -> vector<1x256xf32>
    %c0_15 = arith.constant 0 : index
    %c0_16 = arith.constant 0 : index
    %20 = memref.load %arg7[%c0_15, %c0_16] : memref<1x1xf32, #tpu.memory_space<smem>>
    %21 = vector.broadcast %20 : f32 to vector<1x256xf32>
    %22 = arith.addf %19, %21 : vector<1x256xf32>
    %c0_17 = arith.constant 0 : index
    %c0_18 = arith.constant 0 : index
    %c0_19 = arith.constant 0 : index
    %23 = vector.load %arg8[%c0_17, %c0_18, %c0_19] : memref<1x1x256xf32, #tpu.memory_space<vmem>>, vector<1x1x256xf32>
    %24 = vector.shape_cast %23 : vector<1x1x256xf32> to vector<1x256xf32>
    %25 = vector.shape_cast %22 : vector<1x256xf32> to vector<1x1x256xf32>
    tpu.vector_store %arg8[%c0_17, %c0_18, %c0_19], %25 {strides = array<i32>} : memref<1x1x256xf32, #tpu.memory_space<vmem>>, vector<1x1x256xf32>,
    return
  }
  func.func @transform_0(%arg0: i32) -> (i32, i32) {
    %c0_i32 = arith.constant 0 : i32
    %c0_i32_0 = arith.constant 0 : i32
    return %arg0, %c0_i32 : i32, i32
  }
  func.func @transform_1(%arg0: i32) -> (i32, i32) {
    %c0_i32 = arith.constant 0 : i32
    %c0_i32_0 = arith.constant 0 : i32
    %c0_i32_1 = arith.constant 0 : i32
    return %c0_i32, %c0_i32_0 : i32, i32
  }
  func.func @transform_2(%arg0: i32) -> (i32, i32) {
    %c0_i32 = arith.constant 0 : i32
    %c0_i32_0 = arith.constant 0 : i32
    %c0_i32_1 = arith.constant 0 : i32
    return %c0_i32, %c0_i32_0 : i32, i32
  }
  func.func @transform_3(%arg0: i32) -> (i32, i32) {
    %c0_i32 = arith.constant 0 : i32
    %c0_i32_0 = arith.constant 0 : i32
    %c0_i32_1 = arith.constant 0 : i32
    return %c0_i32, %c0_i32_0 : i32, i32
  }
  func.func @transform_4(%arg0: i32) -> (i32, i32) {
    %c0_i32 = arith.constant 0 : i32
    %c0_i32_0 = arith.constant 0 : i32
    %c0_i32_1 = arith.constant 0 : i32
    return %c0_i32, %c0_i32_0 : i32, i32
  }
  func.func @transform_5(%arg0: i32) -> (i32, i32) {
    %c0_i32 = arith.constant 0 : i32
    %c0_i32_0 = arith.constant 0 : i32
    %c0_i32_1 = arith.constant 0 : i32
    return %c0_i32, %c0_i32_0 : i32, i32
  }
  func.func @transform_6(%arg0: i32) -> (i32, i32) {
    %c0_i32 = arith.constant 0 : i32
    %c0_i32_0 = arith.constant 0 : i32
    %c0_i32_1 = arith.constant 0 : i32
    return %c0_i32, %c0_i32_0 : i32, i32
  }
  func.func @transform_7(%arg0: i32) -> (i32, i32, i32) {
    %c0_i32 = arith.constant 0 : i32
    %c0_i32_0 = arith.constant 0 : i32
    %c0_i32_1 = arith.constant 0 : i32
    return %arg0, %c0_i32, %c0_i32_0 : i32, i32, i32
  }
}

</mosaic_0001>

<bundles_post_ra>
// kernel: tpu_custom_call.1
= control target key start
LH: loop header
LB: loop body
LE: loop exit
PB: predicated region body
PF: predicated region fallthrough
CT: control target
= control target key end

     0   :  { %13 = vsyncpa [#allocation4], 0  ;;  %s4124_s0 = inlined_call_operand.hbm [shape: f32[4,1024], index: 0, kind: input, shape index: {}]   ;;  %s4125_s1 = inlined_call_operand.hbm [shape: bf16[1024,128], index: 1, kind: input, shape index: {}]   ;;  %s4126_s2 = inlined_call_operand.vmem [shape: f32[1,128], index: 2, kind: input, shape index: {}]   ;;  %s4127_s3 = inlined_call_operand.hbm [shape: bf16[128,128], index: 3, kind: input, shape index: {}]   ;;  %s4128_s4 = inlined_call_operand.vmem [shape: f32[1,128], index: 4, kind: input, shape index: {}]   ;;  %s4129_s5 = inlined_call_operand.vmem [shape: bf16[1,128], index: 5, kind: input, shape index: {}]   ;;  %s4130_s6 = inlined_call_operand.<no memory space> [shape: f32[1,1], index: 6, kind: input, shape index: {}]   ;;  %s4131_s7 = inlined_call_operand.hbm [shape: f32[1,1,256], index: 7, kind: output, shape index: {}]  }
   0x1   :  { %14 = vsyncpa [#allocation7], 0 }
   0x2   :  { %15 = vsyncpa [#allocation5], 0 }
   0x3   :  { %20 = vsyncadd [#allocation4], 32256  ;;  %s3575_s24 = smov [#allocation6]  }
   0x4   :  { %s33_s25 = sshll.u32 %s3575_s24, 4  ;;  %s34_s25 = int_to_ptr.vmem [resolvable:$true] %s33_s25 }
   0x5   :  { %s3497_s26 = scalar_lea.vmem %s34_s25, 8192  ;;  %p3502_p1 = scmp.lt.s32.totalorder %s34_s25, %s34_s25 }
   0x6   :  { %p3498_p0 = scmp.ne.s32.totalorder %s34_s25, %s3497_s26  ;;  %p3503_p2 = scmp.lt.s32.totalorder %s3497_s26, %s3497_s26 }
   0x8   :  { %p3504_p3 = por %p3503_p2, %p3502_p1 }
   0xa   :  { %p3505_p4 = pnand %p3504_p3, %p3498_p0 }
   0xc   :  { %3508 = shalt.err (!%p3505_p4)
}
   0xd   :  { %s3576_s27 = smov 64   ;;  %s3577_s28 = smov 4  }
   0xe   :  { %39 = dma.hbm_to_vmem [thread:$0]  %s4125_s1, 8192, %s34_s25, [#allocation7], %s3576_s27, %s3576_s27, %s3577_s28  }
   0xf   :  { %s3578_s8 = smov [#allocation3]  }
  0x10   :  { %s21_s9 = sshll.u32 %s3578_s8, 4  ;;  %s22_s9 = int_to_ptr.vmem [resolvable:$true] %s21_s9 }
  0x11   :  { %s3517_s10 = scalar_lea.vmem %s22_s9, 512  ;;  %s3521_s11 = scalar_lea.vmem %s22_s9, 32768 }
  0x12   :  { %p3518_p5 = scmp.ne.s32.totalorder %s22_s9, %s3517_s10  ;;  %p3522_p6 = scmp.lt.s32.totalorder %s22_s9, %s22_s9 }
  0x13   :  { %p3523_p7 = scmp.lt.s32.totalorder %s3521_s11, %s3517_s10 }
  0x15   :  { %p3524_p8 = por %p3523_p7, %p3522_p6 }
  0x17   :  { %p3525_p9 = pnand %p3524_p8, %p3518_p5 }
  0x19   :  { %3528 = shalt.err (!%p3525_p9)
}
  0x1a   :  { %s3579_s12 = smov 512   ;;  %s3580_s13 = smov 32  }
  0x1b   :  { %27 = dma.hbm_to_vmem [thread:$0]  %s4124_s0, 512, %s22_s9, [#allocation4], %s3579_s12, %s3579_s12, %s3580_s13  }
  0x1c   :  { %s3581_s16 = smov [#allocation8]  }
  0x1d   :  { %s47_s17 = sshll.u32 %s3581_s16, 4  ;;  %s48_s17 = int_to_ptr.vmem [resolvable:$true] %s47_s17 }
  0x1e   :  { %s3537_s1 = scalar_lea.vmem %s48_s17, 1024  ;;  %p3542_p11 = scmp.lt.s32.totalorder %s48_s17, %s48_s17 }
  0x1f   :  { %p3538_p10 = scmp.ne.s32.totalorder %s48_s17, %s3537_s1  ;;  %p3543_p12 = scmp.lt.s32.totalorder %s3537_s1, %s3537_s1 }
  0x21   :  { %p3544_p13 = por %p3543_p12, %p3542_p11 }
  0x23   :  { %p3545_p0 = pnand %p3544_p13, %p3538_p10 }
  0x25   :  { %3548 = shalt.err (!%p3545_p0)
}
  0x26   :  { %53 = dma.hbm_to_vmem [thread:$0]  %s4127_s3, 1024, %s48_s17, [#allocation7], %s3576_s27, %s3576_s27, %s3577_s28  }
  0x27   :  { %3569 = dma.done.wait [#allocation4], 32768  }
  0x28   :  { %3570 = vsyncadd [#allocation4], 4294934528 }
  0x29   :  { %3571 = dma.done.wait [#allocation7], 9216  }
  0x2a   :  { %3572 = vsyncadd [#allocation7], 4294958080  ;;  %v3417_v0 = vld [vmem:[#allocation6 + $0x78] sm:$0xff]   ;;  %v3421_v4 = vld [vmem:[#allocation6 + $0x70] sm:$0xff]   ;;  %s3583_s23 = smov [#allocation9]  }
  0x2b   :  { %v3418_v1 = vld [vmem:[#allocation6 + $0xf8] sm:$0xff]   ;;  %2870 = vmatprep.subr.bf16.mxu0 %v3417_v0  ;;  %v3422_v5 = vld [vmem:[#allocation6 + $0xf0] sm:$0xff]   ;;  %v3425_v8 = vld [vmem:[#allocation6 + $0x68] sm:$0xff]   ;;  %s2786_s24 = sshll.u32 %s3583_s23, 4  ;;  %s2787_s24 = int_to_ptr.vmem [resolvable:$true] %s2786_s24 }
  0x2c   :  { %v3419_v2 = vld [vmem:[#allocation6 + $0x38] sm:$0xff]   ;;  %2982 = vmatprep.subr.bf16.mxu1 %v3418_v1  ;;  %v3423_v6 = vld [vmem:[#allocation6 + $0x30] sm:$0xff]   ;;  %v3426_v9 = vld [vmem:[#allocation6 + $0xe8] sm:$0xff]   ;;  %s3549_s25 = scalar_lea.vmem %s2787_s24, 32  ;;  %p3554_p2 = scmp.lt.s32.totalorder %s2787_s24, %s2787_s24 }
  0x2d   :  { %v3420_v3 = vld [vmem:[#allocation6 + $0xb8] sm:$0xff]   ;;  %2871 = vmatpush3.bf16.msra.mxu0 %v3419_v2  ;;  %v3424_v7 = vld [vmem:[#allocation6 + $0xb0] sm:$0xff]   ;;  %v3427_v10 = vld [vmem:[#allocation6 + $0x28] sm:$0xff]   ;;  %p3550_p1 = scmp.ne.s32.totalorder %s2787_s24, %s3549_s25  ;;  %p3555_p3 = scmp.lt.s32.totalorder %s3549_s25, %s3549_s25 }
  0x2e   :  { %2983 = vmatpush3.bf16.msra.mxu1 %v3420_v3  ;;  %2872 = vmatprep.subr.bf16.mxu0 %v3421_v4  ;;  %v3428_v11 = vld [vmem:[#allocation6 + $0xa8] sm:$0xff]   ;;  %v3429_v12 = vld [vmem:[#allocation6 + $0x60] sm:$0xff]   ;;  %v3433_v16 = vld [vmem:[#allocation6 + $0x58] sm:$0xff]  }
  0x2f   :  { %2984 = vmatprep.subr.bf16.mxu1 %v3422_v5  ;;  %v3430_v13 = vld [vmem:[#allocation6 + $0xe0] sm:$0xff]   ;;  %v3434_v17 = vld [vmem:[#allocation6 + $0xd8] sm:$0xff]   ;;  %v3437_v20 = vld [vmem:[#allocation6 + $0x50] sm:$0xff]   ;;  %p3556_p4 = por %p3555_p3, %p3554_p2 }
  0x30   :  { %v3431_v14 = vld [vmem:[#allocation6 + $0x20] sm:$0xff]   ;;  %v3435_v18 = vld [vmem:[#allocation6 + $0x18] sm:$0xff]   ;;  %v3438_v21 = vld [vmem:[#allocation6 + $0xd0] sm:$0xff]  }
  0x31   :  { %2873 = vmatpush3.bf16.msra.mxu0 %v3423_v6  ;;  %v3432_v15 = vld [vmem:[#allocation6 + $0xa0] sm:$0xff]   ;;  %v3436_v19 = vld [vmem:[#allocation6 + $0x98] sm:$0xff]   ;;  %v3439_v22 = vld [vmem:[#allocation6 + $0x10] sm:$0xff]   ;;  %p3557_p5 = pnand %p3556_p4, %p3550_p1 }
  0x32   :  { %2985 = vmatpush3.bf16.msra.mxu1 %v3424_v7  ;;  %2874 = vmatprep.subr.bf16.mxu0 %v3425_v8  ;;  %v3440_v23 = vld [vmem:[#allocation6 + $0x90] sm:$0xff]   ;;  %v3441_v24 = vld [vmem:[#allocation6 + $0x48] sm:$0xff]   ;;  %v3445_v28 = vld [vmem:[#allocation6 + $0x40] sm:$0xff]  }
  0x33   :  { %2986 = vmatprep.subr.bf16.mxu1 %v3426_v9  ;;  %v3442_v25 = vld [vmem:[#allocation6 + $0xc8] sm:$0xff]   ;;  %v3446_v29 = vld [vmem:[#allocation6 + $0xc0] sm:$0xff]  }
  0x34   :  { %v3443_v26 = vld [vmem:[#allocation6 + $0x8] sm:$0xff]   ;;  %v3447_v30 = vld [vmem:[#allocation6] sm:$0xff]  }
  0x35   :  { %2875 = vmatpush3.bf16.msra.mxu0 %v3427_v10  ;;  %v3444_v27 = vld [vmem:[#allocation6 + $0x88] sm:$0xff]   ;;  %v3448_v31 = vld [vmem:[#allocation6 + $0x80] sm:$0xff]  }
  0x36   :  { %2987 = vmatpush3.bf16.msra.mxu1 %v3428_v11  ;;  %2876 = vmatprep.subr.bf16.mxu0 %v3429_v12  ;;  %v70_v32 = vld [vmem:[#allocation3] sm:$0xff]  ;;  %v71_v38 = vld [vmem:[#allocation3 + $0x8] sm:$0xff] }
  0x37   :  { %2988 = vmatprep.subr.bf16.mxu1 %v3430_v13  ;;  %v74_v33 = vld [vmem:[#allocation3 + $0x20] sm:$0xff]  ;;  %v75_v39 = vld [vmem:[#allocation3 + $0x28] sm:$0xff] }
  0x38   :  { %v78_v34 = vld [vmem:[#allocation3 + $0x40] sm:$0xff]  ;;  %v582_v36 = vcombine.low %v70_v32, %v74_v33  ;;  %v583_v37 = vcombine.high %v70_v32, %v74_v33  ;;  %v79_v42 = vld [vmem:[#allocation3 + $0x48] sm:$0xff]  ;;  %v584_v44 = vcombine.low %v71_v38, %v75_v39  ;;  %v585_v45 = vcombine.high %v71_v38, %v75_v39 }
  0x39   :  { %2877 = vmatpush3.bf16.msra.mxu0 %v3431_v14  ;;  %v82_v35 = vld [vmem:[#allocation3 + $0x60] sm:$0xff]  ;;  %v83_v43 = vld [vmem:[#allocation3 + $0x68] sm:$0xff] }
  0x3a   :  { %2989 = vmatpush3.bf16.msra.mxu1 %v3432_v15  ;;  %2878 = vmatprep.subr.bf16.mxu0 %v3433_v16  ;;  %v590_v40 = vcombine.low %v78_v34, %v82_v35  ;;  %v591_v41 = vcombine.high %v78_v34, %v82_v35  ;;  %v86_v46 = vld [vmem:[#allocation3 + $0x80] sm:$0xff]  ;;  %v592_v47 = vcombine.low %v79_v42, %v83_v43  ;;  %v87_v56 = vld [vmem:[#allocation3 + $0x88] sm:$0xff] }
  0x3b   :  { %2990 = vmatprep.subr.bf16.mxu1 %v3434_v17  ;;  %v593_v48 = vcombine.high %v79_v42, %v83_v43  ;;  %v90_v49 = vld [vmem:[#allocation3 + $0xa0] sm:$0xff]  ;;  %v91_v57 = vld [vmem:[#allocation3 + $0xa8] sm:$0xff] }
  0x3c   :  { %v94_v50 = vld [vmem:[#allocation3 + $0xc0] sm:$0xff]  ;;  %v1095_v52 = vpack.c.bf16 %v591_v41, %v583_v37  ;;  %v1094_v53 = vpack.c.bf16 %v590_v40, %v582_v36  ;;  %v599_v54 = vcombine.high %v86_v46, %v90_v49  ;;  %v95_v58 = vld [vmem:[#allocation3 + $0xc8] sm:$0xff]  ;;  %v1096_v60 = vpack.c.bf16 %v592_v47, %v584_v44 }
  0x3d   :  { %2879 = vmatpush3.bf16.msra.mxu0 %v3435_v18  ;;  %v98_v51 = vld [vmem:[#allocation3 + $0xe0] sm:$0xff]  ;;  %v1097_v59 = vpack.c.bf16 %v593_v48, %v585_v45  ;;  %v99_v61 = vld [vmem:[#allocation3 + $0xe8] sm:$0xff]  ;;  %v601_v62 = vcombine.high %v87_v56, %v91_v57  ;;  %v598_v3 = vcombine.low %v86_v46, %v90_v49  ;;  %v600_v8 = vcombine.low %v87_v56, %v91_v57  ;;  %v3449_v56 = vld [vmem:[#allocation6 + $0x178] sm:$0xff]  }
  0x3e   :  { %2991 = vmatpush3.bf16.msra.mxu1 %v3436_v19  ;;  %2880 = vmatprep.subr.bf16.mxu0 %v3437_v20  ;;  %v607_v55 = vcombine.high %v94_v50, %v98_v51  ;;  %v102_v63 = vld [vmem:[#allocation3 + $0x100] sm:$0xff]  ;;  %v609_v2 = vcombine.high %v95_v58, %v99_v61  ;;  %v103_v6 = vld [vmem:[#allocation3 + $0x108] sm:$0xff]  ;;  %v606_v7 = vcombine.low %v94_v50, %v98_v51 }
  0x3f   :  { %2992 = vmatprep.subr.bf16.mxu1 %v3438_v21  ;;  %v106_v0 = vld [vmem:[#allocation3 + $0x120] sm:$0xff]  ;;  %1773 = vmatprep.mubr.bf16.mxu0 %v1095_v52  ;;  %v608_v9 = vcombine.low %v95_v58, %v99_v61  ;;  %v107_v10 = vld [vmem:[#allocation3 + $0x128] sm:$0xff] }
  0x40   :  { %v1103_v1 = vpack.c.bf16 %v607_v55, %v599_v54  ;;  %v110_v4 = vld [vmem:[#allocation3 + $0x140] sm:$0xff]  ;;  %1934 = vmatprep.mubr.bf16.mxu1 %v1097_v59  ;;  %v111_v11 = vld [vmem:[#allocation3 + $0x148] sm:$0xff]  ;;  %v1105_v13 = vpack.c.bf16 %v609_v2, %v601_v62  ;;  %v615_v14 = vcombine.high %v102_v63, %v106_v0  ;;  %v617_v16 = vcombine.high %v103_v6, %v107_v10  ;;  %v3450_v59 = vld [vmem:[#allocation6 + $0x138] sm:$0xff]  }
  0x41   :  { %2881 = vmatpush3.bf16.msra.mxu0 %v3439_v22  ;;  %v114_v5 = vld [vmem:[#allocation3 + $0x160] sm:$0xff]  ;;  %v115_v12 = vld [vmem:[#allocation3 + $0x168] sm:$0xff]  ;;  %v1102_v18 = vpack.c.bf16 %v606_v7, %v598_v3  ;;  %v1104_v19 = vpack.c.bf16 %v608_v9, %v600_v8  ;;  %v616_v32 = vcombine.low %v103_v6, %v107_v10  ;;  %v3452_v62 = vld [vmem:[#allocation6 + $0x1b8] sm:$0xff]  }
  0x42   :  { %2993 = vmatpush3.bf16.msra.mxu1 %v3440_v23  ;;  %2882 = vmatprep.subr.bf16.mxu0 %v3441_v24  ;;  %v623_v15 = vcombine.high %v110_v4, %v114_v5  ;;  %v625_v17 = vcombine.high %v111_v11, %v115_v12  ;;  %v118_v21 = vld [vmem:[#allocation3 + $0x180] sm:$0xff]  ;;  %v624_v33 = vcombine.low %v111_v11, %v115_v12  ;;  %v135_v46 = vld [vmem:[#allocation3 + $0x208] sm:$0xff] }
  0x43   :  { %2994 = vmatprep.subr.bf16.mxu1 %v3442_v25  ;;  %v122_v22 = vld [vmem:[#allocation3 + $0x1a0] sm:$0xff]  ;;  %v139_v47 = vld [vmem:[#allocation3 + $0x228] sm:$0xff] }
  0x44   :  { %v1111_v20 = vpack.c.bf16 %v623_v15, %v615_v14  ;;  %v1113_v23 = vpack.c.bf16 %v625_v17, %v617_v16  ;;  %v126_v24 = vld [vmem:[#allocation3 + $0x1c0] sm:$0xff]  ;;  %v631_v34 = vcombine.high %v118_v21, %v122_v22  ;;  %v1112_v39 = vpack.c.bf16 %v624_v33, %v616_v32  ;;  %v143_v48 = vld [vmem:[#allocation3 + $0x248] sm:$0xff] }
  0x45   :  { %2883 = vmatpush3.bf16.msra.mxu0 %v3443_v26  ;;  %v130_v25 = vld [vmem:[#allocation3 + $0x1e0] sm:$0xff]  ;;  %v119_v26 = vld [vmem:[#allocation3 + $0x188] sm:$0xff]  ;;  %v630_v50 = vcombine.low %v118_v21, %v122_v22  ;;  %v649_v57 = vcombine.high %v135_v46, %v139_v47  ;;  %v648_v12 = vcombine.low %v135_v46, %v139_v47 }
  0x46   :  { %2995 = vmatpush3.bf16.msra.mxu1 %v3444_v27  ;;  %2884 = vmatprep.subr.bf16.mxu0 %v3445_v28  ;;  %v123_v27 = vld [vmem:[#allocation3 + $0x1a8] sm:$0xff]  ;;  %v639_v35 = vcombine.high %v126_v24, %v130_v25  ;;  %v134_v41 = vld [vmem:[#allocation3 + $0x200] sm:$0xff]  ;;  %v638_v51 = vcombine.low %v126_v24, %v130_v25 }
  0x47   :  { %2996 = vmatprep.subr.bf16.mxu1 %v3446_v29  ;;  %v127_v28 = vld [vmem:[#allocation3 + $0x1c8] sm:$0xff]  ;;  %v633_v36 = vcombine.high %v119_v26, %v123_v27  ;;  %v138_v42 = vld [vmem:[#allocation3 + $0x220] sm:$0xff]  ;;  %v632_v52 = vcombine.low %v119_v26, %v123_v27  ;;  %v3455_v26 = vld [vmem:[#allocation6 + $0x1f0] sm:$0xff]  }
  0x48   :  { %v131_v29 = vld [vmem:[#allocation3 + $0x1e8] sm:$0xff]  ;;  %v1119_v40 = vpack.c.bf16 %v639_v35, %v631_v34  ;;  %v142_v44 = vld [vmem:[#allocation3 + $0x240] sm:$0xff]  ;;  %v647_v54 = vcombine.high %v134_v41, %v138_v42  ;;  %v1118_v61 = vpack.c.bf16 %v638_v51, %v630_v50  ;;  %v646_v10 = vcombine.low %v134_v41, %v138_v42 }
  0x49   :  { %2885 = vmatpush3.bf16.msra.mxu0 %v3447_v30  ;;  %v614_v30 = vcombine.low %v102_v63, %v106_v0  ;;  %v641_v37 = vcombine.high %v127_v28, %v131_v29  ;;  %v146_v45 = vld [vmem:[#allocation3 + $0x260] sm:$0xff]  ;;  %v147_v49 = vld [vmem:[#allocation3 + $0x268] sm:$0xff] }
  0x4a   :  { %2997 = vmatpush3.bf16.msra.mxu1 %v3448_v31  ;;  %v622_v31 = vcombine.low %v110_v4, %v114_v5  ;;  %v655_v55 = vcombine.high %v142_v44, %v146_v45  ;;  %v657_v58 = vcombine.high %v143_v48, %v147_v49  ;;  %3094 = vmatprep.subr.bf16.mxu0 %v3449_v56  ;;  %v154_v2 = vld [vmem:[#allocation3 + $0x2a0] sm:$0xff]  ;;  %v151_v6 = vld [vmem:[#allocation3 + $0x288] sm:$0xff] }
  0x4b   :  { %v1121_v43 = vpack.c.bf16 %v641_v37, %v633_v36  ;;  %v158_v4 = vld [vmem:[#allocation3 + $0x2c0] sm:$0xff]  ;;  %v155_v7 = vld [vmem:[#allocation3 + $0x2a8] sm:$0xff]  ;;  %v654_v11 = vcombine.low %v142_v44, %v146_v45 }
  0x4c   :  { %1774 = vmatmul.mubr.bf16.vlgmr.msra.gmra.mxu0 %v1094_v53  ;;  %v1110_v38 = vpack.c.bf16 %v622_v31, %v614_v30  ;;  %v640_v53 = vcombine.low %v127_v28, %v131_v29  ;;  %v1127_v0 = vpack.c.bf16 %v655_v55, %v647_v54  ;;  %v1129_v3 = vpack.c.bf16 %v657_v58, %v649_v57  ;;  %v162_v5 = vld [vmem:[#allocation3 + $0x2e0] sm:$0xff]  ;;  %v159_v8 = vld [vmem:[#allocation3 + $0x2c8] sm:$0xff]  ;;  %v3456_v30 = vld [vmem:[#allocation6 + $0x1b0] sm:$0xff]  }
  0x4d   :  { %1935 = vmatmul.mubr.bf16.vlgmr.msra.gmra.mxu1 %v1096_v60  ;;  %1781 = vmatprep.mubr.bf16.mxu0 %v1103_v1  ;;  %v3451_v60 = vld [vmem:[#allocation6 + $0x1f8] sm:$0xff]   ;;  %v150_v1 = vld [vmem:[#allocation3 + $0x280] sm:$0xff]  ;;  %v163_v9 = vld [vmem:[#allocation3 + $0x2e8] sm:$0xff]  ;;  %v671_v15 = vcombine.high %v158_v4, %v162_v5  ;;  %v665_v16 = vcombine.high %v151_v6, %v155_v7  ;;  %v670_v35 = vcombine.low %v158_v4, %v162_v5 }
  0x4e   :  { %1942 = vmatprep.mubr.bf16.mxu1 %v1105_v13  ;;  %3095 = vmatpush3.bf16.msra.mxu0 %v3450_v59  ;;  %v1120_v63 = vpack.c.bf16 %v640_v53, %v632_v52  ;;  %v656_v13 = vcombine.low %v143_v48, %v147_v49  ;;  %v663_v14 = vcombine.high %v150_v1, %v154_v2  ;;  %v3641_v21 = vld [vmem:[#allocation3 + $0x320] sm:$0xff]  ;;  %v167_v29 = vld [vmem:[#allocation3 + $0x308] sm:$0xff] }
  0x4f   :  { %3206 = vmatprep.subr.bf16.mxu1 %v3451_v60  ;;  %v673_v17 = vcombine.high %v159_v8, %v163_v9  ;;  %v174_v22 = vld [vmem:[#allocation3 + $0x340] sm:$0xff]  ;;  %v171_v31 = vld [vmem:[#allocation3 + $0x328] sm:$0xff]  ;;  %v662_v34 = vcombine.low %v150_v1, %v154_v2  ;;  %v664_v36 = vcombine.low %v151_v6, %v155_v7  ;;  %v672_v37 = vcombine.low %v159_v8, %v163_v9 }
  0x50   :  { %3207 = vmatpush3.bf16.msra.mxu1 %v3452_v62  ;;  %v1128_v24 = vpack.c.bf16 %v656_v13, %v648_v12  ;;  %v1135_v25 = vpack.c.bf16 %v671_v15, %v663_v14  ;;  %v178_v28 = vld [vmem:[#allocation3 + $0x360] sm:$0xff]  ;;  %v175_v32 = vld [vmem:[#allocation3 + $0x348] sm:$0xff]  ;;  %v680_v60 = vcombine.low %v167_v29, %v171_v31 }
  0x51   :  { %v1137_v27 = vpack.c.bf16 %v673_v17, %v665_v16  ;;  %v179_v33 = vld [vmem:[#allocation3 + $0x368] sm:$0xff]  ;;  %3208 = vmatprep.subr.bf16.mxu1 %v3455_v26  ;;  %v1134_v42 = vpack.c.bf16 %v670_v35, %v662_v34  ;;  %v3647_v44 = vld [vmem:[#allocation3 + $0x3a0] sm:$0xff]  ;;  %v1136_v48 = vpack.c.bf16 %v672_v37, %v664_v36  ;;  %v686_v59 = vcombine.low %v174_v22, %v178_v28  ;;  %v3468_v34 = vld [vmem:[#allocation6 + $0x198] sm:$0xff]  }
  0x52   :  { %v689_v41 = vcombine.high %v175_v32, %v179_v33  ;;  %v3649_v45 = vld [vmem:[#allocation3 + $0x3c0] sm:$0xff]  ;;  %v3457_v47 = vld [vmem:[#allocation6 + $0x168] sm:$0xff]  }
  0x53   :  { %v3651_v46 = vld [vmem:[#allocation3 + $0x3e0] sm:$0xff]  ;;  %v3653_v50 = vld [vmem:[#allocation3 + $0x388] sm:$0xff] }
  0x54   :  { %1782 = vmatmul.mubr.bf16.gmra.mxu0 %v1102_v18  ;;  %v3453_v18 = vld [vmem:[#allocation6 + $0x170] sm:$0xff]   ;;  %3209 = vmatpush3.bf16.msra.mxu1 %v3456_v30  ;;  %v3655_v51 = vld [vmem:[#allocation3 + $0x3a8] sm:$0xff]  ;;  %v3461_v2 = vld [vmem:[#allocation6 + $0x160] sm:$0xff]  }
  0x55   :  { %1943 = vmatmul.mubr.bf16.gmra.mxu1 %v1104_v19  ;;  %1789 = vmatprep.mubr.bf16.mxu0 %v1111_v20  ;;  %v1126_v19 = vpack.c.bf16 %v654_v11, %v646_v10  ;;  %v3639_v20 = vld [vmem:[#allocation3 + $0x300] sm:$0xff]  ;;  %v3657_v52 = vld [vmem:[#allocation3 + $0x3c8] sm:$0xff] }
  0x56   :  { %1950 = vmatprep.mubr.bf16.mxu1 %v1113_v23  ;;  %v3454_v23 = vld [vmem:[#allocation6 + $0x130] sm:$0xff]   ;;  %3096 = vmatprep.subr.bf16.mxu0 %v3453_v18  ;;  %v3458_v53 = vld [vmem:[#allocation6 + $0x128] sm:$0xff]   ;;  %v678_v58 = vcombine.low %v3639_v20, %v3641_v21  ;;  %v3668_v4 = vld [vmem:[#allocation3 + $0x400] sm:$0xff] }
  0x57   :  { %3097 = vmatpush3.bf16.msra.mxu0 %v3454_v23  ;;  %v3459_v55 = vld [vmem:[#allocation6 + $0x1e8] sm:$0xff]   ;;  %v3670_v5 = vld [vmem:[#allocation3 + $0x420] sm:$0xff] }
  0x58   :  { %3098 = vmatprep.subr.bf16.mxu0 %v3457_v47  ;;  %v195_v56 = vld [vmem:[#allocation3 + $0x3e8] sm:$0xff]  ;;  %3210 = vmatprep.subr.bf16.mxu1 %v3459_v55  ;;  %v3672_v6 = vld [vmem:[#allocation3 + $0x440] sm:$0xff] }
  0x59   :  { %v3460_v57 = vld [vmem:[#allocation6 + $0x1a8] sm:$0xff]   ;;  %v705_v1 = vcombine.high %v3657_v52, %v195_v56  ;;  %v3462_v7 = vld [vmem:[#allocation6 + $0x1e0] sm:$0xff]  }
  0x5a   :  { %3211 = vmatpush3.bf16.msra.mxu1 %v3460_v57  ;;  %v3463_v10 = vld [vmem:[#allocation6 + $0x120] sm:$0xff]   ;;  %v3674_v13 = vld [vmem:[#allocation3 + $0x408] sm:$0xff] }
  0x5b   :  { %3099 = vmatpush3.bf16.msra.mxu0 %v3458_v53  ;;  %v210_v12 = vld [vmem:[#allocation3 + $0x460] sm:$0xff]  ;;  %3212 = vmatprep.subr.bf16.mxu1 %v3462_v7  ;;  %v3676_v15 = vld [vmem:[#allocation3 + $0x428] sm:$0xff] }
  0x5c   :  { %1790 = vmatmul.mubr.bf16.gmra.mxu0 %v1110_v38  ;;  %v679_v38 = vcombine.high %v3639_v20, %v3641_v21  ;;  %3100 = vmatprep.subr.bf16.mxu0 %v3461_v2  ;;  %v3464_v14 = vld [vmem:[#allocation6 + $0x1a0] sm:$0xff]   ;;  %v3678_v16 = vld [vmem:[#allocation3 + $0x448] sm:$0xff]  ;;  %v696_v20 = vcombine.low %v3653_v50, %v3655_v51  ;;  %v704_v21 = vcombine.low %v3657_v52, %v195_v56 }
  0x5d   :  { %1951 = vmatmul.mubr.bf16.gmra.mxu1 %v1112_v39  ;;  %1797 = vmatprep.mubr.bf16.mxu0 %v1119_v40  ;;  %v687_v39 = vcombine.high %v174_v22, %v178_v28  ;;  %v681_v40 = vcombine.high %v167_v29, %v171_v31  ;;  %v211_v17 = vld [vmem:[#allocation3 + $0x468] sm:$0xff]  ;;  %v711_v22 = vcombine.high %v3668_v4, %v3670_v5  ;;  %v3467_v28 = vld [vmem:[#allocation6 + $0x118] sm:$0xff]   ;;  %v3693_v30 = vld [vmem:[#allocation3 + $0x480] sm:$0xff] }
  0x5e   :  { %1958 = vmatprep.mubr.bf16.mxu1 %v1121_v43  ;;  %v3645_v43 = vld [vmem:[#allocation3 + $0x380] sm:$0xff]  ;;  %3213 = vmatpush3.bf16.msra.mxu1 %v3464_v14  ;;  %v719_v23 = vcombine.high %v3672_v6, %v210_v12  ;;  %v721_v26 = vcombine.high %v3678_v16, %v211_v17  ;;  %v1152_v35 = vpack.c.bf16 %v704_v21, %v696_v20  ;;  %v3701_v37 = vld [vmem:[#allocation3 + $0x488] sm:$0xff] }
  0x5f   :  { %v1143_v49 = vpack.c.bf16 %v687_v39, %v679_v38  ;;  %v1145_v54 = vpack.c.bf16 %v689_v41, %v681_v40  ;;  %v695_v62 = vcombine.high %v3645_v43, %v3647_v44  ;;  %3101 = vmatpush3.bf16.msra.mxu0 %v3463_v10  ;;  %v694_v18 = vcombine.low %v3645_v43, %v3647_v44  ;;  %v3695_v31 = vld [vmem:[#allocation3 + $0x4a0] sm:$0xff]  ;;  %v3703_v38 = vld [vmem:[#allocation3 + $0x4a8] sm:$0xff]  ;;  %v3469_v41 = vld [vmem:[#allocation6 + $0x150] sm:$0xff]  }
  0x60   :  { %v1159_v36 = vpack.c.bf16 %v719_v23, %v711_v22  ;;  %v3705_v39 = vld [vmem:[#allocation3 + $0x4c8] sm:$0xff]  ;;  %v3470_v43 = vld [vmem:[#allocation6 + $0x1d0] sm:$0xff]   ;;  %v712_v47 = vcombine.low %v3674_v13, %v3676_v15  ;;  %v729_v52 = vcombine.high %v3701_v37, %v3703_v38  ;;  %v3723_v55 = vld [vmem:[#allocation3 + $0x500] sm:$0xff] }
  0x61   :  { %v3707_v40 = vld [vmem:[#allocation3 + $0x4e8] sm:$0xff]  ;;  %v3471_v44 = vld [vmem:[#allocation6 + $0x110] sm:$0xff]   ;;  %v3725_v56 = vld [vmem:[#allocation3 + $0x520] sm:$0xff] }
  0x62   :  { %v737_v53 = vcombine.high %v3705_v39, %v3707_v40  ;;  %v238_v57 = vld [vmem:[#allocation3 + $0x540] sm:$0xff]  ;;  %v3474_v2 = vld [vmem:[#allocation6 + $0x1c8] sm:$0xff]   ;;  %v736_v10 = vcombine.low %v3705_v39, %v3707_v40 }
  0x63   :  { %v246_v21 = vld [vmem:[#allocation3 + $0x580] sm:$0xff] }
  0x64   :  { %1798 = vmatmul.mubr.bf16.gmra.mxu0 %v1118_v61  ;;  %v688_v61 = vcombine.low %v175_v32, %v179_v33  ;;  %v3697_v32 = vld [vmem:[#allocation3 + $0x4c0] sm:$0xff] }
  0x65   :  { %1959 = vmatmul.mubr.bf16.gmra.mxu1 %v1120_v63  ;;  %1805 = vmatprep.mubr.bf16.mxu0 %v1127_v0  ;;  %v703_v63 = vcombine.high %v3649_v45, %v3651_v46  ;;  %v697_v0 = vcombine.high %v3653_v50, %v3655_v51  ;;  %v3699_v33 = vld [vmem:[#allocation3 + $0x4e0] sm:$0xff]  ;;  %v727_v50 = vcombine.high %v3693_v30, %v3695_v31 }
  0x66   :  { %1966 = vmatprep.mubr.bf16.mxu1 %v1129_v3  ;;  %v1142_v3 = vpack.c.bf16 %v686_v59, %v678_v58  ;;  %v1144_v8 = vpack.c.bf16 %v688_v61, %v680_v60  ;;  %v735_v51 = vcombine.high %v3697_v32, %v3699_v33  ;;  %v242_v58 = vld [vmem:[#allocation3 + $0x560] sm:$0xff]  ;;  %v3473_v59 = vld [vmem:[#allocation6 + $0x148] sm:$0xff]   ;;  %v734_v7 = vcombine.low %v3697_v32, %v3699_v33 }
  0x67   :  { %v1151_v9 = vpack.c.bf16 %v703_v63, %v695_v62  ;;  %v1153_v11 = vpack.c.bf16 %v705_v1, %v697_v0  ;;  %v231_v62 = vld [vmem:[#allocation3 + $0x508] sm:$0xff]  ;;  %v250_v22 = vld [vmem:[#allocation3 + $0x5a0] sm:$0xff] }
  0x68   :  { %v1167_v61 = vpack.c.bf16 %v735_v51, %v727_v50  ;;  %v235_v63 = vld [vmem:[#allocation3 + $0x528] sm:$0xff]  ;;  %v758_v50 = vcombine.low %v246_v21, %v250_v22 }
  0x69   :  { %v239_v0 = vld [vmem:[#allocation3 + $0x548] sm:$0xff]  ;;  %v745_v14 = vcombine.high %v231_v62, %v235_v63  ;;  %v744_v32 = vcombine.low %v231_v62, %v235_v63  ;;  %v282_v62 = vld [vmem:[#allocation3 + $0x6a0] sm:$0xff] }
  0x6a   :  { %v243_v1 = vld [vmem:[#allocation3 + $0x568] sm:$0xff] }
  0x6b   :  { %v752_v33 = vcombine.low %v239_v0, %v243_v1 }
  0x6c   :  { %1806 = vmatmul.mubr.bf16.gmra.mxu0 %v1126_v19  ;;  %v702_v19 = vcombine.low %v3649_v45, %v3651_v46  ;;  %v710_v45 = vcombine.low %v3668_v4, %v3670_v5  ;;  %v718_v46 = vcombine.low %v3672_v6, %v210_v12  ;;  %v3475_v4 = vld [vmem:[#allocation6 + $0x108] sm:$0xff]   ;;  %v726_v6 = vcombine.low %v3693_v30, %v3695_v31 }
  0x6d   :  { %1967 = vmatmul.mubr.bf16.gmra.mxu1 %v1128_v24  ;;  %1813 = vmatprep.mubr.bf16.mxu0 %v1135_v25  ;;  %v3465_v24 = vld [vmem:[#allocation6 + $0x158] sm:$0xff]   ;;  %v713_v25 = vcombine.high %v3674_v13, %v3676_v15  ;;  %v3476_v5 = vld [vmem:[#allocation6 + $0x188] sm:$0xff]   ;;  %v751_v12 = vcombine.high %v238_v57, %v242_v58  ;;  %v3478_v13 = vld [vmem:[#allocation6 + $0x1c0] sm:$0xff]   ;;  %v753_v15 = vcombine.high %v239_v0, %v243_v1 }
  0x6e   :  { %1974 = vmatprep.mubr.bf16.mxu1 %v1137_v27  ;;  %v3466_v27 = vld [vmem:[#allocation6 + $0x1d8] sm:$0xff]   ;;  %3102 = vmatprep.subr.bf16.mxu0 %v3465_v24  ;;  %v1150_v29 = vpack.c.bf16 %v702_v19, %v694_v18  ;;  %v1166_v18 = vpack.c.bf16 %v734_v7, %v726_v6  ;;  %v254_v24 = vld [vmem:[#allocation3 + $0x5c0] sm:$0xff]  ;;  %v742_v30 = vcombine.low %v3723_v55, %v3725_v56 }
  0x6f   :  { %3214 = vmatprep.subr.bf16.mxu1 %v3466_v27  ;;  %3103 = vmatpush3.bf16.msra.mxu0 %v3467_v28  ;;  %v1177_v23 = vpack.c.bf16 %v753_v15, %v745_v14  ;;  %v251_v27 = vld [vmem:[#allocation3 + $0x5a8] sm:$0xff]  ;;  %v750_v31 = vcombine.low %v238_v57, %v242_v58  ;;  %v1176_v39 = vpack.c.bf16 %v752_v33, %v744_v32  ;;  %v286_v0 = vld [vmem:[#allocation3 + $0x6c0] sm:$0xff] }
  0x70   :  { %3215 = vmatpush3.bf16.msra.mxu1 %v3468_v34  ;;  %3104 = vmatprep.subr.bf16.mxu0 %v3469_v41  ;;  %v255_v28 = vld [vmem:[#allocation3 + $0x5c8] sm:$0xff]  ;;  %v759_v34 = vcombine.high %v246_v21, %v250_v22  ;;  %v262_v41 = vld [vmem:[#allocation3 + $0x600] sm:$0xff] }
  0x71   :  { %3216 = vmatprep.subr.bf16.mxu1 %v3470_v43  ;;  %v290_v1 = vld [vmem:[#allocation3 + $0x6e0] sm:$0xff]  ;;  %v295_v22 = vld [vmem:[#allocation3 + $0x708] sm:$0xff] }
  0x72   :  { %v306_v21 = vld [vmem:[#allocation3 + $0x760] sm:$0xff] }
  0x73   :  { %3105 = vmatpush3.bf16.msra.mxu0 %v3471_v44  ;;  %v270_v44 = vld [vmem:[#allocation3 + $0x640] sm:$0xff] }
  0x74   :  { %1814 = vmatmul.mubr.bf16.gmra.mxu0 %v1134_v42  ;;  %v1161_v42 = vpack.c.bf16 %v721_v26, %v713_v25  ;;  %3106 = vmatprep.subr.bf16.mxu0 %v3473_v59  ;;  %v258_v25 = vld [vmem:[#allocation3 + $0x5e0] sm:$0xff]  ;;  %v247_v26 = vld [vmem:[#allocation3 + $0x588] sm:$0xff] }
  0x75   :  { %1975 = vmatmul.mubr.bf16.gmra.mxu1 %v1136_v48  ;;  %1821 = vmatprep.mubr.bf16.mxu0 %v1143_v49  ;;  %v3472_v48 = vld [vmem:[#allocation6 + $0x190] sm:$0xff]   ;;  %v720_v49 = vcombine.low %v3678_v16, %v211_v17  ;;  %v3479_v16 = vld [vmem:[#allocation6 + $0x100] sm:$0xff]   ;;  %v766_v51 = vcombine.low %v254_v24, %v258_v25 }
  0x76   :  { %1982 = vmatprep.mubr.bf16.mxu1 %v1145_v54  ;;  %3217 = vmatpush3.bf16.msra.mxu1 %v3472_v48  ;;  %v1158_v54 = vpack.c.bf16 %v718_v46, %v710_v45  ;;  %v3480_v17 = vld [vmem:[#allocation6 + $0x180] sm:$0xff]   ;;  %v263_v46 = vld [vmem:[#allocation3 + $0x608] sm:$0xff] }
  0x77   :  { %v1160_v60 = vpack.c.bf16 %v720_v49, %v712_v47  ;;  %3218 = vmatprep.subr.bf16.mxu1 %v3474_v2  ;;  %3107 = vmatpush3.bf16.msra.mxu0 %v3475_v4  ;;  %v274_v45 = vld [vmem:[#allocation3 + $0x660] sm:$0xff]  ;;  %v267_v47 = vld [vmem:[#allocation3 + $0x628] sm:$0xff]  ;;  %v1182_v58 = vpack.c.bf16 %v766_v51, %v758_v50 }
  0x78   :  { %v271_v48 = vld [vmem:[#allocation3 + $0x648] sm:$0xff]  ;;  %v782_v7 = vcombine.low %v270_v44, %v274_v45 }
  0x79   :  { %v275_v49 = vld [vmem:[#allocation3 + $0x668] sm:$0xff] }
  0x7a   :  { %3219 = vmatpush3.bf16.msra.mxu1 %v3476_v5  ;;  %v785_v57 = vcombine.high %v271_v48, %v275_v49  ;;  %v279_v2 = vld [vmem:[#allocation3 + $0x688] sm:$0xff] }
  0x7b   :  { %3220 = vmatprep.subr.bf16.mxu1 %v3478_v13  ;;  %v287_v4 = vld [vmem:[#allocation3 + $0x6c8] sm:$0xff] }
  0x7c   :  { %1822 = vmatmul.mubr.bf16.gmra.mxu0 %v1142_v3  ;;  %v1169_v3 = vpack.c.bf16 %v737_v53, %v729_v52  ;;  %v760_v52 = vcombine.low %v247_v26, %v251_v27  ;;  %v291_v5 = vld [vmem:[#allocation3 + $0x6e8] sm:$0xff] }
  0x7d   :  { %1983 = vmatmul.mubr.bf16.gmra.mxu1 %v1144_v8  ;;  %1829 = vmatprep.mubr.bf16.mxu0 %v1151_v9  ;;  %v728_v8 = vcombine.low %v3701_v37, %v3703_v38  ;;  %v3477_v9 = vld [vmem:[#allocation6 + $0x140] sm:$0xff]   ;;  %v1174_v38 = vpack.c.bf16 %v750_v31, %v742_v30  ;;  %v801_v13 = vcombine.high %v287_v4, %v291_v5 }
  0x7e   :  { %1990 = vmatprep.mubr.bf16.mxu1 %v1153_v11  ;;  %v743_v11 = vcombine.high %v3723_v55, %v3725_v56  ;;  %3108 = vmatprep.subr.bf16.mxu0 %v3477_v9  ;;  %v783_v55 = vcombine.high %v270_v44, %v274_v45  ;;  %v777_v56 = vcombine.high %v263_v46, %v267_v47  ;;  %v319_v44 = vld [vmem:[#allocation3 + $0x7c8] sm:$0xff] }
  0x7f   :  { %v1168_v19 = vpack.c.bf16 %v736_v10, %v728_v8  ;;  %3109 = vmatpush3.bf16.msra.mxu0 %v3479_v16  ;;  %3221 = vmatpush3.bf16.msra.mxu1 %v3480_v17  ;;  %v776_v8 = vcombine.low %v263_v46, %v267_v47  ;;  %v784_v9 = vcombine.low %v271_v48, %v275_v49  ;;  %v294_v17 = vld [vmem:[#allocation3 + $0x700] sm:$0xff]  ;;  %v323_v45 = vld [vmem:[#allocation3 + $0x7e8] sm:$0xff] }
  0x80   :  { %v1175_v20 = vpack.c.bf16 %v751_v12, %v743_v11  ;;  %v1193_v63 = vpack.c.bf16 %v785_v57, %v777_v56  ;;  %v799_v11 = vcombine.high %v286_v0, %v290_v1  ;;  %v76_v56 = vld [vmem:[#allocation3 + $0x30] sm:$0xff] }
  0x81   :  { %v1192_v15 = vpack.c.bf16 %v784_v9, %v776_v8  ;;  %v80_v57 = vld [vmem:[#allocation3 + $0x50] sm:$0xff] }
  0x84   :  { %1830 = vmatmul.mubr.bf16.gmra.mxu0 %v1150_v29  ;;  %v259_v29 = vld [vmem:[#allocation3 + $0x5e8] sm:$0xff] }
  0x85   :  { %1991 = vmatmul.mubr.bf16.gmra.mxu1 %v1152_v35  ;;  %1837 = vmatprep.mubr.bf16.mxu0 %v1159_v36  ;;  %v767_v35 = vcombine.high %v254_v24, %v258_v25  ;;  %v761_v36 = vcombine.high %v247_v26, %v251_v27  ;;  %v769_v37 = vcombine.high %v255_v28, %v259_v29  ;;  %v303_v24 = vld [vmem:[#allocation3 + $0x748] sm:$0xff] }
  0x86   :  { %1998 = vmatprep.mubr.bf16.mxu1 %v1161_v42  ;;  %v266_v42 = vld [vmem:[#allocation3 + $0x620] sm:$0xff]  ;;  %v768_v53 = vcombine.low %v255_v28, %v259_v29  ;;  %v307_v25 = vld [vmem:[#allocation3 + $0x768] sm:$0xff]  ;;  %v798_v27 = vcombine.low %v286_v0, %v290_v1  ;;  %v800_v29 = vcombine.low %v287_v4, %v291_v5  ;;  %v85_v0 = vld [vmem:[#allocation3 + $0x78] sm:$0xff]  ;;  %v832_v5 = vcombine.low %v319_v44, %v323_v45 }
  0x87   :  { %v1183_v40 = vpack.c.bf16 %v767_v35, %v759_v34  ;;  %v1185_v43 = vpack.c.bf16 %v769_v37, %v761_v36  ;;  %v774_v6 = vcombine.low %v262_v41, %v266_v42  ;;  %v817_v33 = vcombine.high %v303_v24, %v307_v25  ;;  %v310_v37 = vld [vmem:[#allocation3 + $0x780] sm:$0xff] }
  0x88   :  { %v1184_v59 = vpack.c.bf16 %v768_v53, %v760_v52  ;;  %v816_v49 = vcombine.low %v303_v24, %v307_v25  ;;  %v833_v53 = vcombine.high %v319_v44, %v323_v45 }
  0x89   :  { %v1190_v14 = vpack.c.bf16 %v782_v7, %v774_v6 }
  0x8c   :  { %1838 = vmatmul.mubr.bf16.gmra.mxu0 %v1158_v54  ;;  %v775_v54 = vcombine.high %v262_v41, %v266_v42  ;;  %v322_v41 = vld [vmem:[#allocation3 + $0x7e0] sm:$0xff]  ;;  %v311_v42 = vld [vmem:[#allocation3 + $0x788] sm:$0xff] }
  0x8d   :  { %1999 = vmatmul.mubr.bf16.gmra.mxu1 %v1160_v60  ;;  %1845 = vmatprep.mubr.bf16.mxu0 %v1167_v61  ;;  %v278_v61 = vld [vmem:[#allocation3 + $0x680] sm:$0xff] }
  0x8e   :  { %2006 = vmatprep.mubr.bf16.mxu1 %v1169_v3  ;;  %v1191_v60 = vpack.c.bf16 %v783_v55, %v775_v54  ;;  %v283_v3 = vld [vmem:[#allocation3 + $0x6a8] sm:$0xff]  ;;  %v791_v10 = vcombine.high %v278_v61, %v282_v62  ;;  %v790_v26 = vcombine.low %v278_v61, %v282_v62  ;;  %v72_v55 = vld [vmem:[#allocation3 + $0x10] sm:$0xff]  ;;  %v73_v61 = vld [vmem:[#allocation3 + $0x18] sm:$0xff] }
  0x8f   :  { %v793_v12 = vcombine.high %v279_v2, %v283_v3  ;;  %v792_v28 = vcombine.low %v279_v2, %v283_v3  ;;  %v77_v62 = vld [vmem:[#allocation3 + $0x38] sm:$0xff]  ;;  %v587_v6 = vcombine.high %v72_v55, %v76_v56 }
  0x90   :  { %v1199_v16 = vpack.c.bf16 %v799_v11, %v791_v10  ;;  %v1198_v34 = vpack.c.bf16 %v798_v27, %v790_v26  ;;  %v589_v8 = vcombine.high %v73_v61, %v77_v62  ;;  %v588_v24 = vcombine.low %v73_v61, %v77_v62  ;;  %v133_v61 = vld [vmem:[#allocation3 + $0x1f8] sm:$0xff] }
  0x91   :  { %v1200_v35 = vpack.c.bf16 %v800_v29, %v792_v28 }
  0x94   :  { %1846 = vmatmul.mubr.bf16.gmra.mxu0 %v1166_v18  ;;  %v298_v18 = vld [vmem:[#allocation3 + $0x720] sm:$0xff] }
  0x95   :  { %2007 = vmatmul.mubr.bf16.gmra.mxu1 %v1168_v19  ;;  %1853 = vmatprep.mubr.bf16.mxu0 %v1175_v20  ;;  %v1201_v19 = vpack.c.bf16 %v801_v13, %v793_v12  ;;  %v302_v20 = vld [vmem:[#allocation3 + $0x740] sm:$0xff]  ;;  %v807_v30 = vcombine.high %v294_v17, %v298_v18  ;;  %v806_v46 = vcombine.low %v294_v17, %v298_v18  ;;  %v88_v13 = vld [vmem:[#allocation3 + $0x90] sm:$0xff]  ;;  %v89_v18 = vld [vmem:[#allocation3 + $0x98] sm:$0xff] }
  0x96   :  { %2014 = vmatprep.mubr.bf16.mxu1 %v1177_v23  ;;  %v299_v23 = vld [vmem:[#allocation3 + $0x728] sm:$0xff]  ;;  %v815_v31 = vcombine.high %v302_v20, %v306_v21  ;;  %v814_v47 = vcombine.low %v302_v20, %v306_v21  ;;  %v100_v17 = vld [vmem:[#allocation3 + $0xf0] sm:$0xff]  ;;  %v97_v20 = vld [vmem:[#allocation3 + $0xd8] sm:$0xff] }
  0x97   :  { %v809_v32 = vcombine.high %v295_v22, %v299_v23  ;;  %v808_v48 = vcombine.low %v295_v22, %v299_v23  ;;  %v101_v21 = vld [vmem:[#allocation3 + $0xf8] sm:$0xff]  ;;  %v586_v22 = vcombine.low %v72_v55, %v76_v56  ;;  %v128_v56 = vld [vmem:[#allocation3 + $0x1d0] sm:$0xff] }
  0x98   :  { %v1207_v36 = vpack.c.bf16 %v815_v31, %v807_v30  ;;  %v1206_v54 = vpack.c.bf16 %v814_v47, %v806_v46  ;;  %v613_v29 = vcombine.high %v97_v20, %v101_v21  ;;  %v612_v45 = vcombine.low %v97_v20, %v101_v21 }
  0x9c   :  { %1854 = vmatmul.mubr.bf16.gmra.mxu0 %v1174_v38  ;;  %v314_v38 = vld [vmem:[#allocation3 + $0x7a0] sm:$0xff] }
  0x9d   :  { %2015 = vmatmul.mubr.bf16.gmra.mxu1 %v1176_v39  ;;  %1861 = vmatprep.mubr.bf16.mxu0 %v1183_v40  ;;  %v1209_v39 = vpack.c.bf16 %v817_v33, %v809_v32  ;;  %v318_v40 = vld [vmem:[#allocation3 + $0x7c0] sm:$0xff]  ;;  %v823_v50 = vcombine.high %v310_v37, %v314_v38  ;;  %v822_v2 = vcombine.low %v310_v37, %v314_v38  ;;  %v104_v33 = vld [vmem:[#allocation3 + $0x110] sm:$0xff]  ;;  %v105_v38 = vld [vmem:[#allocation3 + $0x118] sm:$0xff] }
  0x9e   :  { %2022 = vmatprep.mubr.bf16.mxu1 %v1185_v43  ;;  %v315_v43 = vld [vmem:[#allocation3 + $0x7a8] sm:$0xff]  ;;  %v831_v51 = vcombine.high %v318_v40, %v322_v41  ;;  %v830_v3 = vcombine.low %v318_v40, %v322_v41  ;;  %v116_v37 = vld [vmem:[#allocation3 + $0x170] sm:$0xff]  ;;  %v113_v40 = vld [vmem:[#allocation3 + $0x158] sm:$0xff] }
  0x9f   :  { %v825_v52 = vcombine.high %v311_v42, %v315_v43  ;;  %v824_v4 = vcombine.low %v311_v42, %v315_v43  ;;  %v117_v41 = vld [vmem:[#allocation3 + $0x178] sm:$0xff] }
  0xa0   :  { %v1214_v10 = vpack.c.bf16 %v830_v3, %v822_v2 }
  0xa1   :  { %v1217_v1 = vpack.c.bf16 %v833_v53, %v825_v52  ;;  %v1216_v11 = vpack.c.bf16 %v832_v5, %v824_v4  ;;  %v120_v53 = vld [vmem:[#allocation3 + $0x190] sm:$0xff] }
  0xa4   :  { %1862 = vmatmul.mubr.bf16.gmra.mxu0 %v1182_v58  ;;  %v84_v58 = vld [vmem:[#allocation3 + $0x70] sm:$0xff] }
  0xa5   :  { %2023 = vmatmul.mubr.bf16.gmra.mxu1 %v1184_v59  ;;  %1869 = vmatprep.mubr.bf16.mxu0 %v1191_v60  ;;  %v1208_v59 = vpack.c.bf16 %v816_v49, %v808_v48  ;;  %v1215_v60 = vpack.c.bf16 %v831_v51, %v823_v50  ;;  %v595_v7 = vcombine.high %v80_v57, %v84_v58 }
  0xa6   :  { %2030 = vmatprep.mubr.bf16.mxu1 %v1193_v63  ;;  %v81_v63 = vld [vmem:[#allocation3 + $0x58] sm:$0xff]  ;;  %v594_v23 = vcombine.low %v80_v57, %v84_v58  ;;  %v629_v49 = vcombine.high %v113_v40, %v117_v41  ;;  %v132_v57 = vld [vmem:[#allocation3 + $0x1f0] sm:$0xff] }
  0xa7   :  { %v597_v9 = vcombine.high %v81_v63, %v85_v0  ;;  %v1099_v12 = vpack.c.bf16 %v595_v7, %v587_v6  ;;  %v596_v25 = vcombine.low %v81_v63, %v85_v0  ;;  %v121_v58 = vld [vmem:[#allocation3 + $0x198] sm:$0xff]  ;;  %v643_v3 = vcombine.high %v128_v56, %v132_v57 }
  0xa8   :  { %v1098_v30 = vpack.c.bf16 %v594_v23, %v586_v22 }
  0xa9   :  { %v1100_v31 = vpack.c.bf16 %v596_v25, %v588_v24 }
  0xac   :  { %1870 = vmatmul.mubr.bf16.gmra.mxu0 %v1190_v14  ;;  %v92_v14 = vld [vmem:[#allocation3 + $0xb0] sm:$0xff] }
  0xad   :  { %2031 = vmatmul.mubr.bf16.gmra.mxu1 %v1192_v15  ;;  %1877 = vmatprep.mubr.bf16.mxu0 %v1199_v16  ;;  %v1101_v15 = vpack.c.bf16 %v597_v9, %v589_v8  ;;  %v96_v16 = vld [vmem:[#allocation3 + $0xd0] sm:$0xff]  ;;  %v603_v26 = vcombine.high %v88_v13, %v92_v14  ;;  %v602_v42 = vcombine.low %v88_v13, %v92_v14  ;;  %v137_v14 = vld [vmem:[#allocation3 + $0x218] sm:$0xff] }
  0xae   :  { %2038 = vmatprep.mubr.bf16.mxu1 %v1201_v19  ;;  %v93_v19 = vld [vmem:[#allocation3 + $0xb8] sm:$0xff]  ;;  %v611_v27 = vcombine.high %v96_v16, %v100_v17  ;;  %v610_v43 = vcombine.low %v96_v16, %v100_v17  ;;  %v136_v9 = vld [vmem:[#allocation3 + $0x210] sm:$0xff] }
  0xaf   :  { %v605_v28 = vcombine.high %v89_v18, %v93_v19  ;;  %v604_v44 = vcombine.low %v89_v18, %v93_v19  ;;  %v148_v13 = vld [vmem:[#allocation3 + $0x270] sm:$0xff]  ;;  %v145_v16 = vld [vmem:[#allocation3 + $0x258] sm:$0xff]  ;;  %v642_v19 = vcombine.low %v128_v56, %v132_v57 }
  0xb0   :  { %v1107_v32 = vpack.c.bf16 %v611_v27, %v603_v26  ;;  %v1106_v50 = vpack.c.bf16 %v610_v43, %v602_v42  ;;  %v149_v17 = vld [vmem:[#allocation3 + $0x278] sm:$0xff] }
  0xb1   :  { %v1108_v51 = vpack.c.bf16 %v612_v45, %v604_v44  ;;  %v661_v25 = vcombine.high %v145_v16, %v149_v17  ;;  %v177_v56 = vld [vmem:[#allocation3 + $0x358] sm:$0xff] }
  0xb2   :  { %v181_v57 = vld [vmem:[#allocation3 + $0x378] sm:$0xff] }
  0xb4   :  { %1878 = vmatmul.mubr.bf16.gmra.mxu0 %v1198_v34  ;;  %v108_v34 = vld [vmem:[#allocation3 + $0x130] sm:$0xff] }
  0xb5   :  { %2039 = vmatmul.mubr.bf16.gmra.mxu1 %v1200_v35  ;;  %1885 = vmatprep.mubr.bf16.mxu0 %v1207_v36  ;;  %v1109_v35 = vpack.c.bf16 %v613_v29, %v605_v28  ;;  %v112_v36 = vld [vmem:[#allocation3 + $0x150] sm:$0xff]  ;;  %v619_v46 = vcombine.high %v104_v33, %v108_v34  ;;  %v618_v62 = vcombine.low %v104_v33, %v108_v34  ;;  %v153_v34 = vld [vmem:[#allocation3 + $0x298] sm:$0xff] }
  0xb6   :  { %2046 = vmatprep.mubr.bf16.mxu1 %v1209_v39  ;;  %v109_v39 = vld [vmem:[#allocation3 + $0x138] sm:$0xff]  ;;  %v627_v47 = vcombine.high %v112_v36, %v116_v37  ;;  %v626_v63 = vcombine.low %v112_v36, %v116_v37  ;;  %v152_v29 = vld [vmem:[#allocation3 + $0x290] sm:$0xff] }
  0xb7   :  { %v621_v48 = vcombine.high %v105_v38, %v109_v39  ;;  %v620_v0 = vcombine.low %v105_v38, %v109_v39  ;;  %v164_v33 = vld [vmem:[#allocation3 + $0x2f0] sm:$0xff]  ;;  %v161_v36 = vld [vmem:[#allocation3 + $0x2d8] sm:$0xff] }
  0xb8   :  { %v1115_v52 = vpack.c.bf16 %v627_v47, %v619_v46  ;;  %v1114_v6 = vpack.c.bf16 %v626_v63, %v618_v62  ;;  %v165_v37 = vld [vmem:[#allocation3 + $0x2f8] sm:$0xff] }
  0xb9   :  { %v1117_v55 = vpack.c.bf16 %v629_v49, %v621_v48  ;;  %v677_v45 = vcombine.high %v161_v36, %v165_v37  ;;  %v168_v49 = vld [vmem:[#allocation3 + $0x310] sm:$0xff] }
  0xbc   :  { %1886 = vmatmul.mubr.bf16.gmra.mxu0 %v1206_v54  ;;  %v124_v54 = vld [vmem:[#allocation3 + $0x1b0] sm:$0xff] }
  0xbd   :  { %2047 = vmatmul.mubr.bf16.gmra.mxu1 %v1208_v59  ;;  %1893 = vmatprep.mubr.bf16.mxu0 %v1215_v60  ;;  %v125_v59 = vld [vmem:[#allocation3 + $0x1b8] sm:$0xff]  ;;  %v635_v2 = vcombine.high %v120_v53, %v124_v54  ;;  %v634_v18 = vcombine.low %v120_v53, %v124_v54  ;;  %v180_v53 = vld [vmem:[#allocation3 + $0x370] sm:$0xff] }
  0xbe   :  { %2054 = vmatprep.mubr.bf16.mxu1 %v1217_v1  ;;  %v129_v60 = vld [vmem:[#allocation3 + $0x1d8] sm:$0xff]  ;;  %v628_v1 = vcombine.low %v113_v40, %v117_v41  ;;  %v637_v4 = vcombine.high %v121_v58, %v125_v59  ;;  %v636_v20 = vcombine.low %v121_v58, %v125_v59  ;;  %v660_v41 = vcombine.low %v145_v16, %v149_v17 }
  0xbf   :  { %v645_v5 = vcombine.high %v129_v60, %v133_v61  ;;  %v1123_v8 = vpack.c.bf16 %v643_v3, %v635_v2  ;;  %v644_v21 = vcombine.low %v129_v60, %v133_v61  ;;  %v1122_v26 = vpack.c.bf16 %v642_v19, %v634_v18  ;;  %v169_v54 = vld [vmem:[#allocation3 + $0x318] sm:$0xff] }
  0xc0   :  { %v1116_v7 = vpack.c.bf16 %v628_v1, %v620_v0  ;;  %v676_v61 = vcombine.low %v161_v36, %v165_v37  ;;  %v693_v1 = vcombine.high %v177_v56, %v181_v57  ;;  %v692_v17 = vcombine.low %v177_v56, %v181_v57  ;;  %v3481_v57 = vld [vmem:[#allocation8 + $0x38] sm:$0xff]  }
  0xc1   :  { %v1124_v27 = vpack.c.bf16 %v644_v21, %v636_v20  ;;  %3360 = vmatprep.subr.bf16.mxu0 %v3481_v57 }
  0xc4   :  { %1894 = vmatmul.mubr.bf16.gmra.mxu0 %v1214_v10  ;;  %v140_v10 = vld [vmem:[#allocation3 + $0x230] sm:$0xff] }
  0xc5   :  { %2055 = vmatmul.mubr.bf16.gmra.mxu1 %v1216_v11  ;;  %2095 = vmatprep.mubr.bf16.mxu0 %v1099_v12  ;;  %v1125_v11 = vpack.c.bf16 %v645_v5, %v637_v4  ;;  %v144_v12 = vld [vmem:[#allocation3 + $0x250] sm:$0xff]  ;;  %v651_v22 = vcombine.high %v136_v9, %v140_v10  ;;  %v650_v38 = vcombine.low %v136_v9, %v140_v10  ;;  %v185_v10 = vld [vmem:[#allocation3 + $0x398] sm:$0xff] }
  0xc6   :  { %2256 = vmatprep.mubr.bf16.mxu1 %v1101_v15  ;;  %v141_v15 = vld [vmem:[#allocation3 + $0x238] sm:$0xff]  ;;  %v659_v23 = vcombine.high %v144_v12, %v148_v13  ;;  %v658_v39 = vcombine.low %v144_v12, %v148_v13  ;;  %v184_v5 = vld [vmem:[#allocation3 + $0x390] sm:$0xff] }
  0xc7   :  { %v653_v24 = vcombine.high %v137_v14, %v141_v15  ;;  %v652_v40 = vcombine.low %v137_v14, %v141_v15  ;;  %v196_v9 = vld [vmem:[#allocation3 + $0x3f0] sm:$0xff]  ;;  %v193_v12 = vld [vmem:[#allocation3 + $0x3d8] sm:$0xff] }
  0xc8   :  { %v1131_v28 = vpack.c.bf16 %v659_v23, %v651_v22  ;;  %v1130_v46 = vpack.c.bf16 %v658_v39, %v650_v38  ;;  %v197_v13 = vld [vmem:[#allocation3 + $0x3f8] sm:$0xff] }
  0xc9   :  { %v1132_v47 = vpack.c.bf16 %v660_v41, %v652_v40  ;;  %v709_v21 = vcombine.high %v193_v12, %v197_v13  ;;  %v708_v37 = vcombine.low %v193_v12, %v197_v13 }
  0xcc   :  { %2096 = vmatmul.mubr.bf16.vlgmr.msra.gmra.mxu0 %v1098_v30  ;;  %v156_v30 = vld [vmem:[#allocation3 + $0x2b0] sm:$0xff] }
  0xcd   :  { %2257 = vmatmul.mubr.bf16.vlgmr.msra.gmra.mxu1 %v1100_v31  ;;  %2103 = vmatprep.mubr.bf16.mxu0 %v1107_v32  ;;  %v1133_v31 = vpack.c.bf16 %v661_v25, %v653_v24  ;;  %v160_v32 = vld [vmem:[#allocation3 + $0x2d0] sm:$0xff]  ;;  %v667_v42 = vcombine.high %v152_v29, %v156_v30  ;;  %v666_v58 = vcombine.low %v152_v29, %v156_v30  ;;  %v201_v30 = vld [vmem:[#allocation3 + $0x418] sm:$0xff] }
  0xce   :  { %2264 = vmatprep.mubr.bf16.mxu1 %v1109_v35  ;;  %v157_v35 = vld [vmem:[#allocation3 + $0x2b8] sm:$0xff]  ;;  %v675_v43 = vcombine.high %v160_v32, %v164_v33  ;;  %v674_v59 = vcombine.low %v160_v32, %v164_v33  ;;  %v200_v25 = vld [vmem:[#allocation3 + $0x410] sm:$0xff]  ;;  %3361 = vmatpush3.bf16.msra.mxu0 %v3481_v57 }
  0xcf   :  { %v669_v44 = vcombine.high %v153_v34, %v157_v35  ;;  %v668_v60 = vcombine.low %v153_v34, %v157_v35  ;;  %v212_v29 = vld [vmem:[#allocation3 + $0x470] sm:$0xff]  ;;  %v209_v32 = vld [vmem:[#allocation3 + $0x458] sm:$0xff] }
  0xd0   :  { %v1139_v48 = vpack.c.bf16 %v675_v43, %v667_v42  ;;  %v1138_v2 = vpack.c.bf16 %v674_v59, %v666_v58  ;;  %v213_v33 = vld [vmem:[#allocation3 + $0x478] sm:$0xff] }
  0xd1   :  { %v1140_v3 = vpack.c.bf16 %v676_v61, %v668_v60  ;;  %v725_v41 = vcombine.high %v209_v32, %v213_v33  ;;  %v724_v58 = vcombine.low %v209_v32, %v213_v33 }
  0xd4   :  { %2104 = vmatmul.mubr.bf16.gmra.mxu0 %v1106_v50  ;;  %v172_v50 = vld [vmem:[#allocation3 + $0x330] sm:$0xff] }
  0xd5   :  { %2265 = vmatmul.mubr.bf16.gmra.mxu1 %v1108_v51  ;;  %2111 = vmatprep.mubr.bf16.mxu0 %v1115_v52  ;;  %v1141_v51 = vpack.c.bf16 %v677_v45, %v669_v44  ;;  %v176_v52 = vld [vmem:[#allocation3 + $0x350] sm:$0xff]  ;;  %v683_v62 = vcombine.high %v168_v49, %v172_v50  ;;  %v682_v14 = vcombine.low %v168_v49, %v172_v50  ;;  %v217_v50 = vld [vmem:[#allocation3 + $0x498] sm:$0xff] }
  0xd6   :  { %2272 = vmatprep.mubr.bf16.mxu1 %v1117_v55  ;;  %v173_v55 = vld [vmem:[#allocation3 + $0x338] sm:$0xff]  ;;  %v691_v63 = vcombine.high %v176_v52, %v180_v53  ;;  %v690_v15 = vcombine.low %v176_v52, %v180_v53  ;;  %v3739_v45 = vld [vmem:[#allocation3 + $0x490] sm:$0xff] }
  0xd7   :  { %v685_v0 = vcombine.high %v169_v54, %v173_v55  ;;  %v684_v16 = vcombine.low %v169_v54, %v173_v55  ;;  %v228_v49 = vld [vmem:[#allocation3 + $0x4f0] sm:$0xff]  ;;  %v225_v52 = vld [vmem:[#allocation3 + $0x4d8] sm:$0xff] }
  0xd8   :  { %v1147_v4 = vpack.c.bf16 %v691_v63, %v683_v62  ;;  %v1146_v22 = vpack.c.bf16 %v690_v15, %v682_v14  ;;  %v229_v53 = vld [vmem:[#allocation3 + $0x4f8] sm:$0xff] }
  0xd9   :  { %v1148_v23 = vpack.c.bf16 %v692_v17, %v684_v16  ;;  %v741_v62 = vcombine.high %v225_v52, %v229_v53  ;;  %v3483_v16 = vld [vmem:[#allocation8 + $0x28] sm:$0xff]  }
  0xdc   :  { %2112 = vmatmul.mubr.bf16.gmra.mxu0 %v1114_v6  ;;  %v188_v6 = vld [vmem:[#allocation3 + $0x3b0] sm:$0xff] }
  0xdd   :  { %2273 = vmatmul.mubr.bf16.gmra.mxu1 %v1116_v7  ;;  %2119 = vmatprep.mubr.bf16.mxu0 %v1123_v8  ;;  %v1149_v7 = vpack.c.bf16 %v693_v1, %v685_v0  ;;  %v192_v8 = vld [vmem:[#allocation3 + $0x3d0] sm:$0xff]  ;;  %v699_v18 = vcombine.high %v184_v5, %v188_v6  ;;  %v698_v34 = vcombine.low %v184_v5, %v188_v6 }
  0xde   :  { %2280 = vmatprep.mubr.bf16.mxu1 %v1125_v11  ;;  %v189_v11 = vld [vmem:[#allocation3 + $0x3b8] sm:$0xff]  ;;  %v707_v19 = vcombine.high %v192_v8, %v196_v9  ;;  %v706_v35 = vcombine.low %v192_v8, %v196_v9  ;;  %v3482_v0 = vld [vmem:[#allocation8 + $0x30] sm:$0xff]  }
  0xdf   :  { %v701_v20 = vcombine.high %v185_v10, %v189_v11  ;;  %v700_v36 = vcombine.low %v185_v10, %v189_v11  ;;  %v3746_v6 = vld [vmem:[#allocation3 + $0x550] sm:$0xff]  ;;  %v3750_v8 = vld [vmem:[#allocation3 + $0x518] sm:$0xff]  ;;  %3362 = vmatprep.subr.bf16.mxu0 %v3482_v0 }
  0xe0   :  { %v1155_v24 = vpack.c.bf16 %v707_v19, %v699_v18  ;;  %v1154_v42 = vpack.c.bf16 %v706_v35, %v698_v34  ;;  %v3752_v9 = vld [vmem:[#allocation3 + $0x538] sm:$0xff]  ;;  %3363 = vmatpush3.bf16.msra.mxu0 %v3482_v0  ;;  %v740_v18 = vcombine.low %v225_v52, %v229_v53  ;;  %v3773_v35 = vld [vmem:[#allocation3 + $0x590] sm:$0xff] }
  0xe1   :  { %v1156_v43 = vpack.c.bf16 %v708_v37, %v700_v36  ;;  %v3754_v10 = vld [vmem:[#allocation3 + $0x558] sm:$0xff]  ;;  %3364 = vmatprep.subr.bf16.mxu0 %v3483_v16  ;;  %v3775_v36 = vld [vmem:[#allocation3 + $0x5b0] sm:$0xff]  ;;  %v748_v52 = vcombine.low %v3750_v8, %v3752_v9 }
  0xe2   :  { %v3756_v11 = vld [vmem:[#allocation3 + $0x578] sm:$0xff]  ;;  %v763_v57 = vcombine.high %v3773_v35, %v3775_v36 }
  0xe3   :  { %v756_v53 = vcombine.low %v3754_v10, %v3756_v11 }
  0xe4   :  { %2120 = vmatmul.mubr.bf16.gmra.mxu0 %v1122_v26  ;;  %v204_v26 = vld [vmem:[#allocation3 + $0x430] sm:$0xff] }
  0xe5   :  { %2281 = vmatmul.mubr.bf16.gmra.mxu1 %v1124_v27  ;;  %2127 = vmatprep.mubr.bf16.mxu0 %v1131_v28  ;;  %v1157_v27 = vpack.c.bf16 %v709_v21, %v701_v20  ;;  %v208_v28 = vld [vmem:[#allocation3 + $0x450] sm:$0xff]  ;;  %v715_v38 = vcombine.high %v200_v25, %v204_v26  ;;  %v714_v54 = vcombine.low %v200_v25, %v204_v26  ;;  %v3766_v21 = vld [vmem:[%s4126_s2] ss:$0 sm:$0xff] }
  0xe6   :  { %2288 = vmatprep.mubr.bf16.mxu1 %v1133_v31  ;;  %v205_v31 = vld [vmem:[#allocation3 + $0x438] sm:$0xff]  ;;  %v723_v39 = vcombine.high %v208_v28, %v212_v29  ;;  %v722_v55 = vcombine.low %v208_v28, %v212_v29  ;;  %3365 = vmatpush3.bf16.msra.mxu0 %v3483_v16 }
  0xe7   :  { %v717_v40 = vcombine.high %v201_v30, %v205_v31  ;;  %v716_v56 = vcombine.low %v201_v30, %v205_v31  ;;  %v3484_v30 = vld [vmem:[#allocation8 + $0x20] sm:$0xff]  }
  0xe8   :  { %v1163_v44 = vpack.c.bf16 %v723_v39, %v715_v38  ;;  %v1162_v63 = vpack.c.bf16 %v722_v55, %v714_v54  ;;  %v3777_v39 = vld [vmem:[#allocation3 + $0x5d0] sm:$0xff]  ;;  %3366 = vmatprep.subr.bf16.mxu0 %v3484_v30  ;;  %v3485_v54 = vld [vmem:[#allocation8 + $0x18] sm:$0xff]  }
  0xe9   :  { %v1164_v1 = vpack.c.bf16 %v724_v58, %v716_v56 }
  0xea   :  { %3367 = vmatpush3.bf16.msra.mxu0 %v3484_v30 }
  0xeb   :  { %3368 = vmatprep.subr.bf16.mxu0 %v3485_v54 }
  0xec   :  { %2128 = vmatmul.mubr.bf16.gmra.mxu0 %v1130_v46  ;;  %v220_v46 = vld [vmem:[#allocation3 + $0x4b0] sm:$0xff] }
  0xed   :  { %2289 = vmatmul.mubr.bf16.gmra.mxu1 %v1132_v47  ;;  %2135 = vmatprep.mubr.bf16.mxu0 %v1139_v48  ;;  %v1165_v47 = vpack.c.bf16 %v725_v41, %v717_v40  ;;  %v224_v48 = vld [vmem:[#allocation3 + $0x4d0] sm:$0xff]  ;;  %v731_v59 = vcombine.high %v3739_v45, %v220_v46  ;;  %v730_v13 = vcombine.low %v3739_v45, %v220_v46  ;;  %v3781_v41 = vld [vmem:[#allocation3 + $0x598] sm:$0xff] }
  0xee   :  { %2296 = vmatprep.mubr.bf16.mxu1 %v1141_v51  ;;  %v221_v51 = vld [vmem:[#allocation3 + $0x4b8] sm:$0xff]  ;;  %v739_v60 = vcombine.high %v224_v48, %v228_v49  ;;  %v738_v14 = vcombine.low %v224_v48, %v228_v49  ;;  %v3779_v40 = vld [vmem:[#allocation3 + $0x5f0] sm:$0xff]  ;;  %3369 = vmatpush3.bf16.msra.mxu0 %v3485_v54 }
  0xef   :  { %v733_v61 = vcombine.high %v217_v50, %v221_v51  ;;  %v732_v15 = vcombine.low %v217_v50, %v221_v51  ;;  %v3787_v46 = vld [vmem:[#allocation3 + $0x5b8] sm:$0xff]  ;;  %v771_v58 = vcombine.high %v3777_v39, %v3779_v40  ;;  %v3855_v54 = vld [vmem:[#allocation3 + $0x6f0] sm:$0xff] }
  0xf0   :  { %v1170_v29 = vpack.c.bf16 %v738_v14, %v730_v13  ;;  %v3791_v48 = vld [vmem:[#allocation3 + $0x5f8] sm:$0xff]  ;;  %v3815_v13 = vld [vmem:[#allocation3 + $0x650] sm:$0xff] }
  0xf1   :  { %v1173_v5 = vpack.c.bf16 %v741_v62, %v733_v61  ;;  %v1172_v33 = vpack.c.bf16 %v740_v18, %v732_v15  ;;  %v3817_v14 = vld [vmem:[#allocation3 + $0x670] sm:$0xff]  ;;  %v3819_v15 = vld [vmem:[#allocation3 + $0x618] sm:$0xff] }
  0xf4   :  { %2136 = vmatmul.mubr.bf16.gmra.mxu0 %v1138_v2  ;;  %v1171_v2 = vpack.c.bf16 %v739_v60, %v731_v59  ;;  %v765_v60 = vcombine.high %v3781_v41, %v3787_v46 }
  0xf5   :  { %2297 = vmatmul.mubr.bf16.gmra.mxu1 %v1140_v3  ;;  %2143 = vmatprep.mubr.bf16.mxu0 %v1147_v4  ;;  %v3742_v3 = vld [vmem:[#allocation3 + $0x510] sm:$0xff] }
  0xf6   :  { %2304 = vmatprep.mubr.bf16.mxu1 %v1149_v7  ;;  %v3744_v4 = vld [vmem:[#allocation3 + $0x530] sm:$0xff] }
  0xf7   :  { %v3748_v7 = vld [vmem:[#allocation3 + $0x570] sm:$0xff]  ;;  %v747_v19 = vcombine.high %v3742_v3, %v3744_v4  ;;  %v746_v45 = vcombine.low %v3742_v3, %v3744_v4 }
  0xf8   :  { %v755_v20 = vcombine.high %v3746_v6, %v3748_v7  ;;  %v754_v51 = vcombine.low %v3746_v6, %v3748_v7  ;;  %v3486_v4 = vld [vmem:[#allocation8 + $0x10] sm:$0xff]   ;;  %v1180_v7 = vpack.c.bf16 %v756_v53, %v748_v52 }
  0xf9   :  { %3370 = vmatprep.subr.bf16.mxu0 %v3486_v4  ;;  %v3853_v53 = vld [vmem:[#allocation3 + $0x6d0] sm:$0xff] }
  0xfa   :  { %v1179_v34 = vpack.c.bf16 %v755_v20, %v747_v19  ;;  %v1178_v3 = vpack.c.bf16 %v754_v51, %v746_v45  ;;  %v762_v19 = vcombine.low %v3773_v35, %v3775_v36  ;;  %v3825_v20 = vld [vmem:[#allocation3 + $0x638] sm:$0xff]  ;;  %3371 = vmatpush3.bf16.msra.mxu0 %v3486_v4 }
  0xfb   :  { %v781_v35 = vcombine.high %v3819_v15, %v3825_v20 }
  0xfc   :  { %2144 = vmatmul.mubr.bf16.gmra.mxu0 %v1146_v22 }
  0xfd   :  { %2305 = vmatmul.mubr.bf16.gmra.mxu1 %v1148_v23  ;;  %2151 = vmatprep.mubr.bf16.mxu0 %v1155_v24  ;;  %v749_v23 = vcombine.high %v3750_v8, %v3752_v9  ;;  %v757_v24 = vcombine.high %v3754_v10, %v3756_v11  ;;  %v1187_v8 = vpack.c.bf16 %v771_v58, %v763_v57  ;;  %v3811_v9 = vld [vmem:[#allocation3 + $0x610] sm:$0xff] }
  0xfe   :  { %2312 = vmatprep.mubr.bf16.mxu1 %v1157_v27  ;;  %v3813_v10 = vld [vmem:[#allocation3 + $0x630] sm:$0xff] }
  0xff   :  { %v1181_v38 = vpack.c.bf16 %v757_v24, %v749_v23  ;;  %v3829_v23 = vld [vmem:[#allocation3 + $0x678] sm:$0xff] }
 0x104   :  { %2152 = vmatmul.mubr.bf16.gmra.mxu0 %v1154_v42 }
 0x105   :  { %2313 = vmatmul.mubr.bf16.gmra.mxu1 %v1156_v43  ;;  %2159 = vmatprep.mubr.bf16.mxu0 %v1163_v44 }
 0x106   :  { %2320 = vmatprep.mubr.bf16.mxu1 %v1165_v47  ;;  %v3789_v47 = vld [vmem:[#allocation3 + $0x5d8] sm:$0xff] }
 0x107   :  { %v773_v61 = vcombine.high %v3789_v47, %v3791_v48 }
 0x10c   :  { %v2886_v12 = vpop.f32.mrf.mxu0  ;;  %2160 = vmatmul.mubr.bf16.gmra.mxu0 %v1162_v63 }
 0x10d   :  { %v2998_v17 = vpop.f32.mrf.mxu1  ;;  %2321 = vmatmul.mubr.bf16.gmra.mxu1 %v1164_v1  ;;  %2167 = vmatprep.mubr.bf16.mxu0 %v1171_v2 }
 0x10e   :  { %v2887_v22 = vpop.f32.mrf.mxu0  ;;  %2328 = vmatprep.mubr.bf16.mxu1 %v1173_v5 }
 0x10f   :  { %v2888_v25 = vadd.f32 %v2887_v22, %v2886_v12  ;;  %v2999_v26 = vpop.f32.mrf.mxu1  ;;  %v1189_v12 = vpack.c.bf16 %v773_v61, %v765_v60  ;;  %v3827_v22 = vld [vmem:[#allocation3 + $0x658] sm:$0xff] }
 0x110   :  { %v3000_v27 = vadd.f32 %v2999_v26, %v2998_v17  ;;  %v2889_v28 = vpop.f32.mrf.mxu0  ;;  %v770_v26 = vcombine.low %v3777_v39, %v3779_v40  ;;  %v789_v36 = vcombine.high %v3827_v22, %v3829_v23  ;;  %v3863_v60 = vld [vmem:[#allocation3 + $0x6b8] sm:$0xff]  ;;  %v788_v4 = vcombine.low %v3827_v22, %v3829_v23 }
 0x111   :  { %v1776_v31 = vadd.f32 %v2888_v25, %v3766_v21  ;;  %v3001_v32 = vpop.f32.mrf.mxu1  ;;  %v3865_v61 = vld [vmem:[#allocation3 + $0x6d8] sm:$0xff] }
 0x112   :  { %v2890_v37 = vpop.f32.mrf.mxu0  ;;  %v1197_v52 = vpack.c.bf16 %v789_v36, %v781_v35  ;;  %v3901_v35 = vld [vmem:[#allocation3 + $0x738] sm:$0xff] }
 0x113   :  { %v3783_v42 = vadd.f32 %v3000_v27, %v1776_v31  ;;  %v2891_v43 = vadd.f32 %v2890_v37, %v2889_v28  ;;  %v3002_v44 = vpop.f32.mrf.mxu1  ;;  %v764_v27 = vcombine.low %v3781_v41, %v3787_v46  ;;  %v772_v28 = vcombine.low %v3789_v47, %v3791_v48  ;;  %v3903_v36 = vld [vmem:[#allocation3 + $0x758] sm:$0xff] }
 0x114   :  { %v3003_v49 = vadd.f32 %v3002_v44, %v3001_v32  ;;  %v2892_v50 = vpop.f32.mrf.mxu0  ;;  %2168 = vmatmul.mubr.bf16.gmra.mxu0 %v1170_v29  ;;  %v3487_v29 = vld [vmem:[#allocation8 + $0x8] sm:$0xff]   ;;  %v779_v32 = vcombine.high %v3811_v9, %v3813_v10  ;;  %v3488_v44 = vld [vmem:[#allocation8] sm:$0xff]  }
 0x115   :  { %v1779_v55 = vadd.f32 %v2891_v43, %v3766_v21  ;;  %v3004_v56 = vpop.f32.mrf.mxu1  ;;  %2329 = vmatmul.mubr.bf16.gmra.mxu1 %v1172_v33  ;;  %2175 = vmatprep.mubr.bf16.mxu0 %v1179_v34  ;;  %v787_v33 = vcombine.high %v3815_v13, %v3817_v14  ;;  %v1186_v43 = vpack.c.bf16 %v770_v26, %v762_v19 }
 0x116   :  { %v2893_v59 = vpop.f32.mrf.mxu0  ;;  %2336 = vmatprep.mubr.bf16.mxu1 %v1181_v38  ;;  %3372 = vmatprep.subr.bf16.mxu0 %v3487_v29  ;;  %v1188_v47 = vpack.c.bf16 %v772_v28, %v764_v27  ;;  %v3891_v28 = vld [vmem:[#allocation3 + $0x750] sm:$0xff] }
 0x117   :  { %v3808_v62 = vadd.f32 %v3003_v49, %v1779_v55  ;;  %v2894_v63 = vadd.f32 %v2893_v59, %v2892_v50  ;;  %v3005_v0 = vpop.f32.mrf.mxu1  ;;  %3373 = vmatpush3.bf16.msra.mxu0 %v3487_v29  ;;  %v1195_v48 = vpack.c.bf16 %v787_v33, %v779_v32  ;;  %v3849_v49 = vld [vmem:[#allocation3 + $0x690] sm:$0xff]  ;;  %v3857_v55 = vld [vmem:[#allocation3 + $0x698] sm:$0xff]  ;;  %v778_v59 = vcombine.low %v3811_v9, %v3813_v10 }
 0x118   :  { %v3006_v1 = vadd.f32 %v3005_v0, %v3004_v56  ;;  %v2895_v2 = vpop.f32.mrf.mxu0  ;;  %v3851_v50 = vld [vmem:[#allocation3 + $0x6b0] sm:$0xff]  ;;  %3374 = vmatprep.subr.bf16.mxu0 %v3488_v44  ;;  %v797_v10 = vcombine.high %v3857_v55, %v3863_v60 }
 0x119   :  { %v1784_v5 = vadd.f32 %v2894_v63, %v3766_v21  ;;  %v3007_v6 = vpop.f32.mrf.mxu1  ;;  %v3867_v63 = vld [vmem:[#allocation3 + $0x6f8] sm:$0xff]  ;;  %v3893_v29 = vld [vmem:[#allocation3 + $0x770] sm:$0xff] }
 0x11a   :  { %v2896_v11 = vpop.f32.mrf.mxu0 }
 0x11b   :  { %v3821_v16 = vadd.f32 %v3006_v1, %v1784_v5  ;;  %v2897_v17 = vadd.f32 %v2896_v11, %v2895_v2  ;;  %v3008_v18 = vpop.f32.mrf.mxu1  ;;  %3375 = vmatpush3.bf16.msra.mxu0 %v3488_v44  ;;  %v786_v2 = vcombine.low %v3815_v13, %v3817_v14  ;;  %v805_v11 = vcombine.high %v3865_v61, %v3867_v63 }
 0x11c   :  { %v3009_v24 = vadd.f32 %v3008_v18, %v3007_v6  ;;  %v2898_v25 = vpop.f32.mrf.mxu0  ;;  %2176 = vmatmul.mubr.bf16.gmra.mxu0 %v1178_v3  ;;  %v780_v3 = vcombine.low %v3819_v15, %v3825_v20  ;;  %v804_v44 = vcombine.low %v3865_v61, %v3867_v63 }
 0x11d   :  { %v1787_v30 = vadd.f32 %v2897_v17, %v3766_v21  ;;  %v3010_v31 = vpop.f32.mrf.mxu1  ;;  %2337 = vmatmul.mubr.bf16.gmra.mxu1 %v1180_v7  ;;  %2183 = vmatprep.mubr.bf16.mxu0 %v1187_v8  ;;  %v795_v7 = vcombine.high %v3849_v49, %v3851_v50  ;;  %v803_v8 = vcombine.high %v3853_v53, %v3855_v54 }
 0x11e   :  { %v2899_v34 = vpop.f32.mrf.mxu0  ;;  %2344 = vmatprep.mubr.bf16.mxu1 %v1189_v12  ;;  %v1194_v18 = vpack.c.bf16 %v786_v2, %v778_v59  ;;  %v1196_v22 = vpack.c.bf16 %v788_v4, %v780_v3  ;;  %v1205_v27 = vpack.c.bf16 %v805_v11, %v797_v10  ;;  %v320_v4 = vld [vmem:[#allocation3 + $0x7d0] sm:$0xff]  ;;  %v317_v11 = vld [vmem:[#allocation3 + $0x7b8] sm:$0xff] }
 0x11f   :  { %v3846_v37 = vadd.f32 %v3009_v24, %v1787_v30  ;;  %v2900_v38 = vadd.f32 %v2899_v34, %v2898_v25  ;;  %v3011_v39 = vpop.f32.mrf.mxu1  ;;  %v1203_v23 = vpack.c.bf16 %v803_v8, %v795_v7  ;;  %v3887_v24 = vld [vmem:[#allocation3 + $0x710] sm:$0xff]  ;;  %v3895_v30 = vld [vmem:[#allocation3 + $0x718] sm:$0xff]  ;;  %v794_v34 = vcombine.low %v3849_v49, %v3851_v50 }
 0x120   :  { %v3012_v40 = vadd.f32 %v3011_v39, %v3010_v31  ;;  %v2901_v41 = vpop.f32.mrf.mxu0  ;;  %v3889_v25 = vld [vmem:[#allocation3 + $0x730] sm:$0xff]  ;;  %v813_v50 = vcombine.high %v3895_v30, %v3901_v35 }
 0x121   :  { %v1792_v45 = vadd.f32 %v2900_v38, %v3766_v21  ;;  %v3013_v46 = vpop.f32.mrf.mxu1  ;;  %v3905_v38 = vld [vmem:[#allocation3 + $0x778] sm:$0xff]  ;;  %v810_v10 = vcombine.low %v3887_v24, %v3889_v25 }
 0x122   :  { %v2902_v51 = vpop.f32.mrf.mxu0 }
 0x123   :  { %v3859_v56 = vadd.f32 %v3012_v40, %v1792_v45  ;;  %v2903_v57 = vadd.f32 %v2902_v51, %v2901_v41  ;;  %v3014_v58 = vpop.f32.mrf.mxu1  ;;  %v802_v41 = vcombine.low %v3853_v53, %v3855_v54  ;;  %v821_v51 = vcombine.high %v3903_v36, %v3905_v38 }
 0x124   :  { %v3015_v0 = vadd.f32 %v3014_v58, %v3013_v46  ;;  %v2904_v1 = vpop.f32.mrf.mxu0  ;;  %2184 = vmatmul.mubr.bf16.gmra.mxu0 %v1186_v43  ;;  %v796_v43 = vcombine.low %v3857_v55, %v3863_v60 }
 0x125   :  { %v1795_v5 = vadd.f32 %v2903_v57, %v3766_v21  ;;  %v3016_v6 = vpop.f32.mrf.mxu1  ;;  %2345 = vmatmul.mubr.bf16.gmra.mxu1 %v1188_v47  ;;  %2191 = vmatprep.mubr.bf16.mxu0 %v1195_v48  ;;  %v811_v47 = vcombine.high %v3887_v24, %v3889_v25  ;;  %v819_v48 = vcombine.high %v3891_v28, %v3893_v29 }
 0x126   :  { %v2905_v9 = vpop.f32.mrf.mxu0  ;;  %2352 = vmatprep.mubr.bf16.mxu1 %v1197_v52  ;;  %v1202_v58 = vpack.c.bf16 %v802_v41, %v794_v34  ;;  %v1204_v61 = vpack.c.bf16 %v804_v44, %v796_v43  ;;  %v1213_v3 = vpack.c.bf16 %v821_v51, %v813_v50 }
 0x127   :  { %v3884_v12 = vadd.f32 %v3015_v0, %v1795_v5  ;;  %v2906_v13 = vadd.f32 %v2905_v9, %v2904_v1  ;;  %v3017_v14 = vpop.f32.mrf.mxu1  ;;  %v1211_v63 = vpack.c.bf16 %v819_v48, %v811_v47  ;;  %v3925_v0 = vld [vmem:[#allocation3 + $0x790] sm:$0xff] }
 0x128   :  { %v3018_v15 = vadd.f32 %v3017_v14, %v3016_v6  ;;  %v2907_v17 = vpop.f32.mrf.mxu0  ;;  %v3927_v1 = vld [vmem:[#allocation3 + $0x7b0] sm:$0xff]  ;;  %v313_v6 = vld [vmem:[#allocation3 + $0x798] sm:$0xff] }
 0x129   :  { %v1800_v19 = vadd.f32 %v2906_v13, %v3766_v21  ;;  %v3019_v20 = vpop.f32.mrf.mxu1  ;;  %v324_v5 = vld [vmem:[#allocation3 + $0x7f0] sm:$0xff]  ;;  %v321_v13 = vld [vmem:[#allocation3 + $0x7d8] sm:$0xff] }
 0x12a   :  { %v2908_v26 = vpop.f32.mrf.mxu0  ;;  %v325_v14 = vld [vmem:[#allocation3 + $0x7f8] sm:$0xff]  ;;  %v835_v25 = vcombine.high %v320_v4, %v324_v5  ;;  %v834_v50 = vcombine.low %v320_v4, %v324_v5 }
 0x12b   :  { %v3897_v31 = vadd.f32 %v3018_v15, %v1800_v19  ;;  %v2909_v32 = vadd.f32 %v2908_v26, %v2907_v17  ;;  %v3020_v33 = vpop.f32.mrf.mxu1  ;;  %v818_v17 = vcombine.low %v3891_v28, %v3893_v29  ;;  %v820_v19 = vcombine.low %v3903_v36, %v3905_v38 }
 0x12c   :  { %v3021_v39 = vadd.f32 %v3020_v33, %v3019_v20  ;;  %v2910_v40 = vpop.f32.mrf.mxu0  ;;  %2192 = vmatmul.mubr.bf16.gmra.mxu0 %v1194_v18  ;;  %v812_v18 = vcombine.low %v3895_v30, %v3901_v35  ;;  %v827_v20 = vcombine.high %v3925_v0, %v3927_v1  ;;  %v837_v28 = vcombine.high %v321_v13, %v325_v14 }
 0x12d   :  { %v1803_v45 = vadd.f32 %v2909_v32, %v3766_v21  ;;  %v3022_v46 = vpop.f32.mrf.mxu1  ;;  %2353 = vmatmul.mubr.bf16.gmra.mxu1 %v1196_v22  ;;  %2199 = vmatprep.mubr.bf16.mxu0 %v1203_v23  ;;  %v1210_v35 = vpack.c.bf16 %v818_v17, %v810_v10 }
 0x12e   :  { %v2911_v49 = vpop.f32.mrf.mxu0  ;;  %2360 = vmatprep.mubr.bf16.mxu1 %v1205_v27  ;;  %v829_v27 = vcombine.high %v313_v6, %v317_v11 }
 0x12f   :  { %v3922_v52 = vadd.f32 %v3021_v39, %v1803_v45  ;;  %v2912_v53 = vadd.f32 %v2911_v49, %v2910_v40  ;;  %v3023_v54 = vpop.f32.mrf.mxu1  ;;  %v1212_v39 = vpack.c.bf16 %v820_v19, %v812_v18  ;;  %v1219_v40 = vpack.c.bf16 %v835_v25, %v827_v20 }
 0x130   :  { %v3024_v55 = vadd.f32 %v3023_v54, %v3022_v46  ;;  %v2913_v57 = vpop.f32.mrf.mxu0  ;;  %v1221_v43 = vpack.c.bf16 %v837_v28, %v829_v27  ;;  %v826_v49 = vcombine.low %v3925_v0, %v3927_v1  ;;  %v828_v54 = vcombine.low %v313_v6, %v317_v11 }
 0x131   :  { %v1808_v59 = vadd.f32 %v2912_v53, %v3766_v21  ;;  %v3025_v60 = vpop.f32.mrf.mxu1 }
 0x132   :  { %v2914_v2 = vpop.f32.mrf.mxu0 }
 0x133   :  { %v3929_v7 = vadd.f32 %v3024_v55, %v1808_v59  ;;  %v2915_v8 = vadd.f32 %v2914_v2, %v2913_v57  ;;  %v3026_v9 = vpop.f32.mrf.mxu1  ;;  %v836_v55 = vcombine.low %v321_v13, %v325_v14  ;;  %v1218_v2 = vpack.c.bf16 %v834_v50, %v826_v49 }
 0x134   :  { %v2916_v15 = vpop.f32.mrf.mxu0  ;;  %2200 = vmatmul.mubr.bf16.gmra.mxu0 %v1202_v58  ;;  %v3027_v23 = vadd.f32 %v3026_v9, %v3025_v60 }
 0x135   :  { %v1811_v22 = vadd.f32 %v2915_v8, %v3766_v21  ;;  %v3028_v24 = vpop.f32.mrf.mxu1  ;;  %2361 = vmatmul.mubr.bf16.gmra.mxu1 %v1204_v61  ;;  %2207 = vmatprep.mubr.bf16.mxu0 %v1211_v63  ;;  %v1220_v1 = vpack.c.bf16 %v836_v55, %v828_v54 }
 0x136   :  { %v2917_v26 = vpop.f32.mrf.mxu0  ;;  %2368 = vmatprep.mubr.bf16.mxu1 %v1213_v3 }
 0x137   :  { %v3942_v29 = vadd.f32 %v3027_v23, %v1811_v22  ;;  %v2918_v30 = vadd.f32 %v2917_v26, %v2916_v15  ;;  %v3029_v32 = vpop.f32.mrf.mxu1 }
 0x138   :  { %v3030_v33 = vadd.f32 %v3029_v32, %v3028_v24  ;;  %v2919_v34 = vpop.f32.mrf.mxu0 }
 0x139   :  { %v1816_v36 = vadd.f32 %v2918_v30, %v3766_v21  ;;  %v3031_v38 = vpop.f32.mrf.mxu1 }
 0x13a   :  { %v2920_v41 = vpop.f32.mrf.mxu0 }
 0x13b   :  { %v3945_v44 = vadd.f32 %v3030_v33, %v1816_v36  ;;  %v2921_v45 = vadd.f32 %v2920_v41, %v2919_v34  ;;  %v3032_v46 = vpop.f32.mrf.mxu1 }
 0x13c   :  { %v3033_v47 = vadd.f32 %v3032_v46, %v3031_v38  ;;  %v2922_v48 = vpop.f32.mrf.mxu0  ;;  %2208 = vmatmul.mubr.bf16.gmra.mxu0 %v1210_v35 }
 0x13d   :  { %v1819_v51 = vadd.f32 %v2921_v45, %v3766_v21  ;;  %v3034_v53 = vpop.f32.mrf.mxu1  ;;  %2369 = vmatmul.mubr.bf16.gmra.mxu1 %v1212_v39  ;;  %2215 = vmatprep.mubr.bf16.mxu0 %v1219_v40 }
 0x13e   :  { %v2923_v57 = vpop.f32.mrf.mxu0  ;;  %2376 = vmatprep.mubr.bf16.mxu1 %v1221_v43 }
 0x13f   :  { %v3950_v58 = vadd.f32 %v3033_v47, %v1819_v51  ;;  %v2924_v59 = vadd.f32 %v2923_v57, %v2922_v48  ;;  %v3035_v60 = vpop.f32.mrf.mxu1 }
 0x140   :  { %v3036_v61 = vadd.f32 %v3035_v60, %v3034_v53  ;;  %v2925_v63 = vpop.f32.mrf.mxu0 }
 0x141   :  { %v1824_v3 = vadd.f32 %v2924_v59, %v3766_v21  ;;  %v3037_v0 = vpop.f32.mrf.mxu1 }
 0x142   :  { %v2926_v4 = vpop.f32.mrf.mxu0 }
 0x143   :  { %v3953_v5 = vadd.f32 %v3036_v61, %v1824_v3  ;;  %v2927_v8 = vadd.f32 %v2926_v4, %v2925_v63  ;;  %v3038_v9 = vpop.f32.mrf.mxu1 }
 0x144   :  { %v3039_v6 = vadd.f32 %v3038_v9, %v3037_v0  ;;  %v2928_v10 = vpop.f32.mrf.mxu0  ;;  %2216 = vmatmul.mubr.bf16.gmra.mxu0 %v1218_v2 }
 0x145   :  { %v1827_v11 = vadd.f32 %v2927_v8, %v3766_v21  ;;  %v3040_v13 = vpop.f32.mrf.mxu1  ;;  %2377 = vmatmul.mubr.bf16.gmra.mxu1 %v1220_v1 }
 0x146   :  { %v2929_v14 = vpop.f32.mrf.mxu0 }
 0x147   :  { %v3956_v15 = vadd.f32 %v3039_v6, %v1827_v11  ;;  %v2930_v17 = vadd.f32 %v2929_v14, %v2928_v10  ;;  %v3041_v18 = vpop.f32.mrf.mxu1 }
 0x148   :  { %v3042_v19 = vadd.f32 %v3041_v18, %v3040_v13  ;;  %v2931_v20 = vpop.f32.mrf.mxu0 }
 0x149   :  { %v1832_v22 = vadd.f32 %v2930_v17, %v3766_v21  ;;  %v3043_v23 = vpop.f32.mrf.mxu1 }
 0x14a   :  { %v2932_v24 = vpop.f32.mrf.mxu0 }
 0x14b   :  { %v3959_v25 = vadd.f32 %v3042_v19, %v1832_v22  ;;  %v2933_v26 = vadd.f32 %v2932_v24, %v2931_v20  ;;  %v3044_v27 = vpop.f32.mrf.mxu1 }
 0x14c   :  { %v3045_v28 = vadd.f32 %v3044_v27, %v3043_v23  ;;  %v2934_v30 = vpop.f32.mrf.mxu0 }
 0x14d   :  { %v1835_v32 = vadd.f32 %v2933_v26, %v3766_v21  ;;  %v3046_v33 = vpop.f32.mrf.mxu1 }
 0x14e   :  { %v2935_v34 = vpop.f32.mrf.mxu0 }
 0x14f   :  { %v3962_v35 = vadd.f32 %v3045_v28, %v1835_v32  ;;  %v2936_v36 = vadd.f32 %v2935_v34, %v2934_v30  ;;  %v3047_v38 = vpop.f32.mrf.mxu1 }
 0x150   :  { %v3048_v39 = vadd.f32 %v3047_v38, %v3046_v33  ;;  %v2937_v40 = vpop.f32.mrf.mxu0 }
 0x151   :  { %v1840_v41 = vadd.f32 %v2936_v36, %v3766_v21  ;;  %v3049_v43 = vpop.f32.mrf.mxu1 }
 0x152   :  { %v2938_v45 = vpop.f32.mrf.mxu0 }
 0x153   :  { %v3965_v46 = vadd.f32 %v3048_v39, %v1840_v41  ;;  %v2939_v47 = vadd.f32 %v2938_v45, %v2937_v40  ;;  %v3050_v48 = vpop.f32.mrf.mxu1 }
 0x154   :  { %v3051_v49 = vadd.f32 %v3050_v48, %v3049_v43  ;;  %v2940_v50 = vpop.f32.mrf.mxu0 }
 0x155   :  { %v1843_v51 = vadd.f32 %v2939_v47, %v3766_v21  ;;  %v3052_v53 = vpop.f32.mrf.mxu1 }
 0x156   :  { %v2941_v54 = vpop.f32.mrf.mxu0 }
 0x157   :  { %v3968_v55 = vadd.f32 %v3051_v49, %v1843_v51  ;;  %v2942_v57 = vadd.f32 %v2941_v54, %v2940_v50  ;;  %v3053_v59 = vpop.f32.mrf.mxu1 }
 0x158   :  { %v3054_v60 = vadd.f32 %v3053_v59, %v3052_v53  ;;  %v2943_v61 = vpop.f32.mrf.mxu0 }
 0x159   :  { %v1848_v63 = vadd.f32 %v2942_v57, %v3766_v21  ;;  %v3055_v2 = vpop.f32.mrf.mxu1 }
 0x15a   :  { %v2944_v3 = vpop.f32.mrf.mxu0 }
 0x15b   :  { %v3971_v0 = vadd.f32 %v3054_v60, %v1848_v63  ;;  %v2945_v1 = vadd.f32 %v2944_v3, %v2943_v61  ;;  %v3056_v4 = vpop.f32.mrf.mxu1 }
 0x15c   :  { %v3057_v8 = vadd.f32 %v3056_v4, %v3055_v2  ;;  %v2946_v9 = vpop.f32.mrf.mxu0 }
 0x15d   :  { %v1851_v6 = vadd.f32 %v2945_v1, %v3766_v21  ;;  %v3058_v10 = vpop.f32.mrf.mxu1 }
 0x15e   :  { %v2947_v11 = vpop.f32.mrf.mxu0 }
 0x15f   :  { %v3974_v13 = vadd.f32 %v3057_v8, %v1851_v6  ;;  %v2948_v14 = vadd.f32 %v2947_v11, %v2946_v9  ;;  %v3059_v17 = vpop.f32.mrf.mxu1 }
 0x160   :  { %v3060_v18 = vadd.f32 %v3059_v17, %v3058_v10  ;;  %v2949_v19 = vpop.f32.mrf.mxu0 }
 0x161   :  { %v1856_v20 = vadd.f32 %v2948_v14, %v3766_v21  ;;  %v3061_v22 = vpop.f32.mrf.mxu1 }
 0x162   :  { %v2950_v23 = vpop.f32.mrf.mxu0 }
 0x163   :  { %v3977_v24 = vadd.f32 %v3060_v18, %v1856_v20  ;;  %v2951_v26 = vadd.f32 %v2950_v23, %v2949_v19  ;;  %v3062_v27 = vpop.f32.mrf.mxu1 }
 0x164   :  { %v3063_v28 = vadd.f32 %v3062_v27, %v3061_v22  ;;  %v2952_v30 = vpop.f32.mrf.mxu0 }
 0x165   :  { %v1859_v32 = vadd.f32 %v2951_v26, %v3766_v21  ;;  %v3064_v33 = vpop.f32.mrf.mxu1 }
 0x166   :  { %v2953_v34 = vpop.f32.mrf.mxu0 }
 0x167   :  { %v3980_v36 = vadd.f32 %v3063_v28, %v1859_v32  ;;  %v2954_v38 = vadd.f32 %v2953_v34, %v2952_v30  ;;  %v3065_v39 = vpop.f32.mrf.mxu1 }
 0x168   :  { %v3066_v40 = vadd.f32 %v3065_v39, %v3064_v33  ;;  %v2955_v41 = vpop.f32.mrf.mxu0 }
 0x169   :  { %v1864_v43 = vadd.f32 %v2954_v38, %v3766_v21  ;;  %v3067_v45 = vpop.f32.mrf.mxu1 }
 0x16a   :  { %v2956_v47 = vpop.f32.mrf.mxu0 }
 0x16b   :  { %v3983_v48 = vadd.f32 %v3066_v40, %v1864_v43  ;;  %v2957_v49 = vadd.f32 %v2956_v47, %v2955_v41  ;;  %v3068_v50 = vpop.f32.mrf.mxu1 }
 0x16c   :  { %v3069_v51 = vadd.f32 %v3068_v50, %v3067_v45  ;;  %v2958_v53 = vpop.f32.mrf.mxu0 }
 0x16d   :  { %v1867_v54 = vadd.f32 %v2957_v49, %v3766_v21  ;;  %v3070_v57 = vpop.f32.mrf.mxu1 }
 0x16e   :  { %v2959_v59 = vpop.f32.mrf.mxu0 }
 0x16f   :  { %v3986_v60 = vadd.f32 %v3069_v51, %v1867_v54  ;;  %v2960_v61 = vadd.f32 %v2959_v59, %v2958_v53  ;;  %v3071_v63 = vpop.f32.mrf.mxu1 }
 0x170   :  { %v3072_v2 = vadd.f32 %v3071_v63, %v3070_v57  ;;  %v2961_v3 = vpop.f32.mrf.mxu0 }
 0x171   :  { %v1872_v1 = vadd.f32 %v2960_v61, %v3766_v21  ;;  %v3073_v4 = vpop.f32.mrf.mxu1 }
 0x172   :  { %v2962_v8 = vpop.f32.mrf.mxu0 }
 0x173   :  { %v3989_v9 = vadd.f32 %v3072_v2, %v1872_v1  ;;  %v2963_v6 = vadd.f32 %v2962_v8, %v2961_v3  ;;  %v3074_v10 = vpop.f32.mrf.mxu1 }
 0x174   :  { %v3075_v11 = vadd.f32 %v3074_v10, %v3073_v4  ;;  %v2964_v14 = vpop.f32.mrf.mxu0 }
 0x175   :  { %v1875_v17 = vadd.f32 %v2963_v6, %v3766_v21  ;;  %v3076_v18 = vpop.f32.mrf.mxu1 }
 0x176   :  { %v2965_v19 = vpop.f32.mrf.mxu0 }
 0x177   :  { %v3992_v20 = vadd.f32 %v3075_v11, %v1875_v17  ;;  %v2966_v22 = vadd.f32 %v2965_v19, %v2964_v14  ;;  %v3077_v23 = vpop.f32.mrf.mxu1 }
 0x178   :  { %v3078_v26 = vadd.f32 %v3077_v23, %v3076_v18  ;;  %v2967_v27 = vpop.f32.mrf.mxu0 }
 0x179   :  { %v1880_v28 = vadd.f32 %v2966_v22, %v3766_v21  ;;  %v3079_v30 = vpop.f32.mrf.mxu1 }
 0x17a   :  { %v2968_v32 = vpop.f32.mrf.mxu0 }
 0x17b   :  { %v3995_v33 = vadd.f32 %v3078_v26, %v1880_v28  ;;  %v2969_v34 = vadd.f32 %v2968_v32, %v2967_v27  ;;  %v3080_v38 = vpop.f32.mrf.mxu1 }
 0x17c   :  { %v3081_v39 = vadd.f32 %v3080_v38, %v3079_v30  ;;  %v2970_v40 = vpop.f32.mrf.mxu0 }
 0x17d   :  { %v1883_v41 = vadd.f32 %v2969_v34, %v3766_v21  ;;  %v3082_v43 = vpop.f32.mrf.mxu1 }
 0x17e   :  { %v2971_v45 = vpop.f32.mrf.mxu0 }
 0x17f   :  { %v3998_v47 = vadd.f32 %v3081_v39, %v1883_v41  ;;  %v2972_v49 = vadd.f32 %v2971_v45, %v2970_v40  ;;  %v3083_v50 = vpop.f32.mrf.mxu1 }
 0x180   :  { %v3084_v51 = vadd.f32 %v3083_v50, %v3082_v43  ;;  %v2973_v53 = vpop.f32.mrf.mxu0 }
 0x181   :  { %v1888_v54 = vadd.f32 %v2972_v49, %v3766_v21  ;;  %v3085_v57 = vpop.f32.mrf.mxu1 }
 0x182   :  { %v2974_v59 = vpop.f32.mrf.mxu0 }
 0x183   :  { %v4001_v61 = vadd.f32 %v3084_v51, %v1888_v54  ;;  %v2975_v63 = vadd.f32 %v2974_v59, %v2973_v53  ;;  %v3086_v2 = vpop.f32.mrf.mxu1 }
 0x184   :  { %v3087_v3 = vadd.f32 %v3086_v2, %v3085_v57  ;;  %v2976_v1 = vpop.f32.mrf.mxu0 }
 0x185   :  { %v1891_v4 = vadd.f32 %v2975_v63, %v3766_v21  ;;  %v3088_v8 = vpop.f32.mrf.mxu1 }
 0x186   :  { %v2977_v6 = vpop.f32.mrf.mxu0 }
 0x187   :  { %v4004_v10 = vadd.f32 %v3087_v3, %v1891_v4  ;;  %v2978_v11 = vadd.f32 %v2977_v6, %v2976_v1  ;;  %v3089_v14 = vpop.f32.mrf.mxu1 }
 0x188   :  { %v3090_v17 = vadd.f32 %v3089_v14, %v3088_v8  ;;  %v2979_v18 = vpop.f32.mrf.mxu0 }
 0x189   :  { %v1896_v19 = vadd.f32 %v2978_v11, %v3766_v21  ;;  %v3091_v22 = vpop.f32.mrf.mxu1 }
 0x18a   :  { %v2980_v23 = vpop.f32.mrf.mxu0 }
 0x18b   :  { %v4007_v26 = vadd.f32 %v3090_v17, %v1896_v19  ;;  %v2981_v27 = vadd.f32 %v2980_v23, %v2979_v18  ;;  %v3092_v28 = vpop.f32.mrf.mxu1 }
 0x18c   :  { %v3093_v30 = vadd.f32 %v3092_v28, %v3091_v22  ;;  %v3110_v32 = vpop.f32.mrf.mxu0 }
 0x18d   :  { %v1899_v34 = vadd.f32 %v2981_v27, %v3766_v21  ;;  %v3222_v38 = vpop.f32.mrf.mxu1 }
 0x18e   :  { %v3111_v39 = vpop.f32.mrf.mxu0 }
 0x18f   :  { %v4010_v40 = vadd.f32 %v3093_v30, %v1899_v34  ;;  %v3112_v41 = vadd.f32 %v3111_v39, %v3110_v32  ;;  %v3223_v43 = vpop.f32.mrf.mxu1 }
 0x190   :  { %v3113_v45 = vpop.f32.mrf.mxu0  ;;  %v3224_v53 = vadd.f32 %v3223_v43, %v3222_v38 }
 0x191   :  { %v2098_v49 = vadd.f32 %v3112_v41, %v3783_v42  ;;  %v3225_v50 = vpop.f32.mrf.mxu1 }
 0x192   :  { %v3114_v51 = vpop.f32.mrf.mxu0 }
 0x193   :  { %v3115_v54 = vadd.f32 %v3114_v51, %v3113_v45  ;;  %v3226_v57 = vpop.f32.mrf.mxu1  ;;  %v2259_v63 = vadd.f32 %v3224_v53, %v2098_v49 }
 0x194   :  { %v3116_v59 = vpop.f32.mrf.mxu0  ;;  %v3227_v3 = vadd.f32 %v3226_v57, %v3225_v50 }
 0x195   :  { %v2101_v2 = vadd.f32 %v3115_v54, %v3808_v62  ;;  %v3228_v21 = vpop.f32.mrf.mxu1  ;;  %v2385_v14 = vmax.f32 %v2259_v63, 0.0 }
 0x196   :  { %v3117_v1 = vpop.f32.mrf.mxu0 }
 0x197   :  { %v2262_v4 = vadd.f32 %v3227_v3, %v2101_v2  ;;  %v3118_v8 = vadd.f32 %v3117_v1, %v3116_v59  ;;  %v3229_v6 = vpop.f32.mrf.mxu1 }
 0x198   :  { %v3119_v11 = vpop.f32.mrf.mxu0  ;;  %v3230_v22 = vadd.f32 %v3229_v6, %v3228_v21 }
 0x199   :  { %v2386_v17 = vmax.f32 %v2262_v4, 0.0  ;;  %v2106_v42 = vadd.f32 %v3118_v8, %v3821_v16  ;;  %v3231_v18 = vpop.f32.mrf.mxu1 }
 0x19a   :  { %v3120_v19 = vpop.f32.mrf.mxu0 }
 0x19b   :  { %v3121_v23 = vadd.f32 %v3120_v19, %v3119_v11  ;;  %v3232_v27 = vpop.f32.mrf.mxu1  ;;  %v2417_v28 = vpack.c.bf16 %v2386_v17, %v2385_v14  ;;  %v2267_v32 = vadd.f32 %v3230_v22, %v2106_v42 }
 0x19c   :  { %v3122_v30 = vpop.f32.mrf.mxu0  ;;  %v3233_v34 = vadd.f32 %v3232_v27, %v3231_v18 }
 0x19d   :  { %v2109_v62 = vadd.f32 %v3121_v23, %v3846_v37  ;;  %v3234_v38 = vpop.f32.mrf.mxu1  ;;  %3376 = vmatprep.mubr.bf16.mxu0 %v2417_v28  ;;  %v2387_v50 = vmax.f32 %v2267_v32, 0.0 }
 0x19e   :  { %v3123_v39 = vpop.f32.mrf.mxu0 }
 0x19f   :  { %v2270_v41 = vadd.f32 %v3233_v34, %v2109_v62  ;;  %v3124_v43 = vadd.f32 %v3123_v39, %v3122_v30  ;;  %v3235_v45 = vpop.f32.mrf.mxu1 }
 0x1a0   :  { %v3125_v49 = vpop.f32.mrf.mxu0  ;;  %v3236_v59 = vadd.f32 %v3235_v45, %v3234_v38 }
 0x1a1   :  { %v2388_v16 = vmax.f32 %v2270_v41, 0.0  ;;  %v2114_v51 = vadd.f32 %v3124_v43, %v3859_v56  ;;  %v3237_v53 = vpop.f32.mrf.mxu1 }
 0x1a2   :  { %v3126_v54 = vpop.f32.mrf.mxu0 }
 0x1a3   :  { %v2418_v57 = vpack.c.bf16 %v2388_v16, %v2387_v50  ;;  %v3127_v63 = vadd.f32 %v3126_v54, %v3125_v49  ;;  %v3238_v2 = vpop.f32.mrf.mxu1  ;;  %v2275_v37 = vadd.f32 %v3236_v59, %v2114_v51 }
 0x1a4   :  { %v3128_v3 = vpop.f32.mrf.mxu0  ;;  %v3239_v1 = vadd.f32 %v3238_v2, %v3237_v53 }
 0x1a5   :  { %v2117_v21 = vadd.f32 %v3127_v63, %v3884_v12  ;;  %v3240_v4 = vpop.f32.mrf.mxu1  ;;  %3377 = vmatmul.mubr.bf16.vlgmr.msra.gmra.mxu0 %v2418_v57  ;;  %v2389_v42 = vmax.f32 %v2275_v37, 0.0 }
 0x1a6   :  { %v3129_v8 = vpop.f32.mrf.mxu0 }
 0x1a7   :  { %v2278_v6 = vadd.f32 %v3239_v1, %v2117_v21  ;;  %v3130_v11 = vadd.f32 %v3129_v8, %v3128_v3  ;;  %v3241_v14 = vpop.f32.mrf.mxu1 }
 0x1a8   :  { %v3131_v17 = vpop.f32.mrf.mxu0  ;;  %v3242_v23 = vadd.f32 %v3241_v14, %v3240_v4 }
 0x1a9   :  { %v2390_v56 = vmax.f32 %v2278_v6, 0.0  ;;  %v2122_v18 = vadd.f32 %v3130_v11, %v3897_v31  ;;  %v3243_v19 = vpop.f32.mrf.mxu1 }
 0x1aa   :  { %v3132_v22 = vpop.f32.mrf.mxu0 }
 0x1ab   :  { %v3133_v27 = vadd.f32 %v3132_v22, %v3131_v17  ;;  %v3244_v28 = vpop.f32.mrf.mxu1  ;;  %v2419_v30 = vpack.c.bf16 %v2390_v56, %v2389_v42  ;;  %v2283_v12 = vadd.f32 %v3242_v23, %v2122_v18 }
 0x1ac   :  { %v3134_v32 = vpop.f32.mrf.mxu0  ;;  %v3245_v34 = vadd.f32 %v3244_v28, %v3243_v19 }
 0x1ad   :  { %v2125_v62 = vadd.f32 %v3133_v27, %v3922_v52  ;;  %v3246_v38 = vpop.f32.mrf.mxu1  ;;  %3380 = vmatprep.mubr.bf16.mxu0 %v2419_v30  ;;  %v2391_v50 = vmax.f32 %v2283_v12, 0.0 }
 0x1ae   :  { %v3135_v39 = vpop.f32.mrf.mxu0 }
 0x1af   :  { %v2286_v41 = vadd.f32 %v3245_v34, %v2125_v62  ;;  %v3136_v43 = vadd.f32 %v3135_v39, %v3134_v32  ;;  %v3247_v45 = vpop.f32.mrf.mxu1 }
 0x1b0   :  { %v3137_v49 = vpop.f32.mrf.mxu0  ;;  %v3248_v57 = vadd.f32 %v3247_v45, %v3246_v38 }
 0x1b1   :  { %v2392_v31 = vmax.f32 %v2286_v41, 0.0  ;;  %v2130_v16 = vadd.f32 %v3136_v43, %v3929_v7  ;;  %v3249_v51 = vpop.f32.mrf.mxu1 }
 0x1b2   :  { %v3138_v53 = vpop.f32.mrf.mxu0 }
 0x1b3   :  { %v2420_v54 = vpack.c.bf16 %v2392_v31, %v2391_v50  ;;  %v3139_v59 = vadd.f32 %v3138_v53, %v3137_v49  ;;  %v3250_v63 = vpop.f32.mrf.mxu1  ;;  %v2291_v52 = vadd.f32 %v3248_v57, %v2130_v16 }
 0x1b4   :  { %v3140_v2 = vpop.f32.mrf.mxu0  ;;  %v3251_v37 = vadd.f32 %v3250_v63, %v3249_v51 }
 0x1b5   :  { %v2133_v3 = vadd.f32 %v3139_v59, %v3942_v29  ;;  %v3252_v21 = vpop.f32.mrf.mxu1  ;;  %3381 = vmatmul.mubr.bf16.gmra.mxu0 %v2420_v54  ;;  %v2393_v14 = vmax.f32 %v2291_v52, 0.0 }
 0x1b6   :  { %v3141_v1 = vpop.f32.mrf.mxu0 }
 0x1b7   :  { %v2294_v4 = vadd.f32 %v3251_v37, %v2133_v3  ;;  %v3142_v8 = vadd.f32 %v3141_v1, %v3140_v2  ;;  %v3253_v6 = vpop.f32.mrf.mxu1 }
 0x1b8   :  { %v3143_v11 = vpop.f32.mrf.mxu0  ;;  %v3254_v18 = vadd.f32 %v3253_v6, %v3252_v21 }
 0x1b9   :  { %v2394_v7 = vmax.f32 %v2294_v4, 0.0  ;;  %v2138_v17 = vadd.f32 %v3142_v8, %v3945_v44  ;;  %v3255_v42 = vpop.f32.mrf.mxu1 }
 0x1ba   :  { %v3144_v56 = vpop.f32.mrf.mxu0 }
 0x1bb   :  { %v3145_v19 = vadd.f32 %v3144_v56, %v3143_v11  ;;  %v3256_v22 = vpop.f32.mrf.mxu1  ;;  %v2421_v23 = vpack.c.bf16 %v2394_v7, %v2393_v14  ;;  %v2299_v29 = vadd.f32 %v3254_v18, %v2138_v17 }
 0x1bc   :  { %v3146_v27 = vpop.f32.mrf.mxu0  ;;  %v3257_v30 = vadd.f32 %v3256_v22, %v3255_v42 }
 0x1bd   :  { %v2141_v28 = vadd.f32 %v3145_v19, %v3950_v58  ;;  %v3258_v32 = vpop.f32.mrf.mxu1  ;;  %3384 = vmatprep.mubr.bf16.mxu0 %v2421_v23  ;;  %v2395_v41 = vmax.f32 %v2299_v29, 0.0 }
 0x1be   :  { %v3147_v12 = vpop.f32.mrf.mxu0 }
 0x1bf   :  { %v2302_v62 = vadd.f32 %v3257_v30, %v2141_v28  ;;  %v3148_v34 = vadd.f32 %v3147_v12, %v3146_v27  ;;  %v3259_v38 = vpop.f32.mrf.mxu1 }
 0x1c0   :  { %v3149_v39 = vpop.f32.mrf.mxu0  ;;  %v3260_v31 = vadd.f32 %v3259_v38, %v3258_v32 }
 0x1c1   :  { %v2396_v44 = vmax.f32 %v2302_v62, 0.0  ;;  %v2146_v43 = vadd.f32 %v3148_v34, %v3953_v5  ;;  %v3261_v45 = vpop.f32.mrf.mxu1 }
 0x1c2   :  { %v3150_v49 = vpop.f32.mrf.mxu0 }
 0x1c3   :  { %v2422_v50 = vpack.c.bf16 %v2396_v44, %v2395_v41  ;;  %v3151_v16 = vadd.f32 %v3150_v49, %v3149_v39  ;;  %v3262_v51 = vpop.f32.mrf.mxu1  ;;  %v2307_v58 = vadd.f32 %v3260_v31, %v2146_v43 }
 0x1c4   :  { %v3152_v53 = vpop.f32.mrf.mxu0  ;;  %v3263_v57 = vadd.f32 %v3262_v51, %v3261_v45 }
 0x1c5   :  { %v2149_v54 = vadd.f32 %v3151_v16, %v3956_v15  ;;  %v3264_v59 = vpop.f32.mrf.mxu1  ;;  %3385 = vmatmul.mubr.bf16.gmra.mxu0 %v2422_v50  ;;  %v2397_v21 = vmax.f32 %v2307_v58, 0.0 }
 0x1c6   :  { %v3153_v63 = vpop.f32.mrf.mxu0 }
 0x1c7   :  { %v2310_v2 = vadd.f32 %v3263_v57, %v2149_v54  ;;  %v3154_v52 = vadd.f32 %v3153_v63, %v3152_v53  ;;  %v3265_v3 = vpop.f32.mrf.mxu1 }
 0x1c8   :  { %v3155_v37 = vpop.f32.mrf.mxu0  ;;  %v3266_v6 = vadd.f32 %v3265_v3, %v3264_v59 }
 0x1c9   :  { %v2398_v5 = vmax.f32 %v2310_v2, 0.0  ;;  %v2154_v1 = vadd.f32 %v3154_v52, %v3959_v25  ;;  %v3267_v4 = vpop.f32.mrf.mxu1 }
 0x1ca   :  { %v3156_v8 = vpop.f32.mrf.mxu0 }
 0x1cb   :  { %v3157_v11 = vadd.f32 %v3156_v8, %v3155_v37  ;;  %v3268_v14 = vpop.f32.mrf.mxu1  ;;  %v2423_v7 = vpack.c.bf16 %v2398_v5, %v2397_v21  ;;  %v2315_v15 = vadd.f32 %v3266_v6, %v2154_v1 }
 0x1cc   :  { %v3158_v17 = vpop.f32.mrf.mxu0  ;;  %v3269_v56 = vadd.f32 %v3268_v14, %v3267_v4 }
 0x1cd   :  { %v2157_v42 = vadd.f32 %v3157_v11, %v3962_v35  ;;  %v3270_v18 = vpop.f32.mrf.mxu1  ;;  %3388 = vmatprep.mubr.bf16.mxu0 %v2423_v7  ;;  %v2399_v28 = vmax.f32 %v2315_v15, 0.0 }
 0x1ce   :  { %v3159_v19 = vpop.f32.mrf.mxu0 }
 0x1cf   :  { %v2318_v22 = vadd.f32 %v3269_v56, %v2157_v42  ;;  %v3160_v23 = vadd.f32 %v3159_v19, %v3158_v17  ;;  %v3271_v27 = vpop.f32.mrf.mxu1 }
 0x1d0   :  { %v3161_v29 = vpop.f32.mrf.mxu0  ;;  %v3272_v34 = vadd.f32 %v3271_v27, %v3270_v18 }
 0x1d1   :  { %v2400_v25 = vmax.f32 %v2318_v22, 0.0  ;;  %v2162_v30 = vadd.f32 %v3160_v23, %v3965_v46  ;;  %v3273_v32 = vpop.f32.mrf.mxu1 }
 0x1d2   :  { %v3162_v12 = vpop.f32.mrf.mxu0 }
 0x1d3   :  { %v2424_v62 = vpack.c.bf16 %v2400_v25, %v2399_v28  ;;  %v3163_v38 = vadd.f32 %v3162_v12, %v3161_v29  ;;  %v3274_v39 = vpop.f32.mrf.mxu1  ;;  %v2323_v35 = vadd.f32 %v3272_v34, %v2162_v30 }
 0x1d4   :  { %v3164_v41 = vpop.f32.mrf.mxu0  ;;  %v3275_v43 = vadd.f32 %v3274_v39, %v3273_v32 }
 0x1d5   :  { %v2165_v44 = vadd.f32 %v3163_v38, %v3968_v55  ;;  %v3276_v45 = vpop.f32.mrf.mxu1  ;;  %3389 = vmatmul.mubr.bf16.gmra.mxu0 %v2424_v62  ;;  %v2401_v53 = vmax.f32 %v2323_v35, 0.0 }
 0x1d6   :  { %v3165_v49 = vpop.f32.mrf.mxu0 }
 0x1d7   :  { %v2326_v50 = vadd.f32 %v3275_v43, %v2165_v44  ;;  %v3166_v31 = vadd.f32 %v3165_v49, %v3164_v41  ;;  %v3277_v16 = vpop.f32.mrf.mxu1 }
 0x1d8   :  { %v3167_v51 = vpop.f32.mrf.mxu0  ;;  %v3278_v59 = vadd.f32 %v3277_v16, %v3276_v45 }
 0x1d9   :  { %v2402_v46 = vmax.f32 %v2326_v50, 0.0  ;;  %v2170_v58 = vadd.f32 %v3166_v31, %v3971_v0  ;;  %v3279_v54 = vpop.f32.mrf.mxu1 }
 0x1da   :  { %v3168_v57 = vpop.f32.mrf.mxu0 }
 0x1db   :  { %v3169_v63 = vadd.f32 %v3168_v57, %v3167_v51  ;;  %v3280_v2 = vpop.f32.mrf.mxu1  ;;  %v2425_v52 = vpack.c.bf16 %v2402_v46, %v2401_v53  ;;  %v2331_v55 = vadd.f32 %v3278_v59, %v2170_v58 }
 0x1dc   :  { %v3170_v3 = vpop.f32.mrf.mxu0  ;;  %v3281_v21 = vadd.f32 %v3280_v2, %v3279_v54 }
 0x1dd   :  { %v2173_v37 = vadd.f32 %v3169_v63, %v3974_v13  ;;  %v3282_v5 = vpop.f32.mrf.mxu1  ;;  %3392 = vmatprep.mubr.bf16.mxu0 %v2425_v52  ;;  %v2403_v14 = vmax.f32 %v2331_v55, 0.0 }
 0x1de   :  { %v3171_v1 = vpop.f32.mrf.mxu0 }
 0x1df   :  { %v2334_v4 = vadd.f32 %v3281_v21, %v2173_v37  ;;  %v3172_v8 = vadd.f32 %v3171_v1, %v3170_v3  ;;  %v3283_v6 = vpop.f32.mrf.mxu1 }
 0x1e0   :  { %v3173_v11 = vpop.f32.mrf.mxu0  ;;  %v3284_v56 = vadd.f32 %v3283_v6, %v3282_v5 }
 0x1e1   :  { %v2404_v0 = vmax.f32 %v2334_v4, 0.0  ;;  %v2178_v7 = vadd.f32 %v3172_v8, %v3977_v24  ;;  %v3285_v17 = vpop.f32.mrf.mxu1 }
 0x1e2   :  { %v3174_v15 = vpop.f32.mrf.mxu0 }
 0x1e3   :  { %v2426_v42 = vpack.c.bf16 %v2404_v0, %v2403_v14  ;;  %v3175_v18 = vadd.f32 %v3174_v15, %v3173_v11  ;;  %v3286_v19 = vpop.f32.mrf.mxu1  ;;  %v2339_v13 = vadd.f32 %v3284_v56, %v2178_v7 }
 0x1e4   :  { %v3176_v22 = vpop.f32.mrf.mxu0  ;;  %v3287_v27 = vadd.f32 %v3286_v19, %v3285_v17 }
 0x1e5   :  { %v2181_v23 = vadd.f32 %v3175_v18, %v3980_v36  ;;  %v3288_v29 = vpop.f32.mrf.mxu1  ;;  %3393 = vmatmul.mubr.bf16.gmra.mxu0 %v2426_v42  ;;  %v2405_v62 = vmax.f32 %v2339_v13, 0.0 }
 0x1e6   :  { %v3177_v28 = vpop.f32.mrf.mxu0 }
 0x1e7   :  { %v2342_v25 = vadd.f32 %v3287_v27, %v2181_v23  ;;  %v3178_v30 = vadd.f32 %v3177_v28, %v3176_v22  ;;  %v3289_v32 = vpop.f32.mrf.mxu1 }
 0x1e8   :  { %v3179_v12 = vpop.f32.mrf.mxu0  ;;  %v3290_v41 = vadd.f32 %v3289_v32, %v3288_v29 }
 0x1e9   :  { %v2406_v24 = vmax.f32 %v2342_v25, 0.0  ;;  %v2186_v34 = vadd.f32 %v3178_v30, %v3983_v48  ;;  %v3291_v38 = vpop.f32.mrf.mxu1 }
 0x1ea   :  { %v3180_v39 = vpop.f32.mrf.mxu0 }
 0x1eb   :  { %v3181_v35 = vadd.f32 %v3180_v39, %v3179_v12  ;;  %v3292_v44 = vpop.f32.mrf.mxu1  ;;  %v2427_v43 = vpack.c.bf16 %v2406_v24, %v2405_v62  ;;  %v2347_v36 = vadd.f32 %v3290_v41, %v2186_v34 }
 0x1ec   :  { %v3182_v45 = vpop.f32.mrf.mxu0  ;;  %v3293_v50 = vadd.f32 %v3292_v44, %v3291_v38 }
 0x1ed   :  { %v2189_v49 = vadd.f32 %v3181_v35, %v3986_v60  ;;  %v3294_v31 = vpop.f32.mrf.mxu1  ;;  %3396 = vmatprep.mubr.bf16.mxu0 %v2427_v43  ;;  %v2407_v54 = vmax.f32 %v2347_v36, 0.0 }
 0x1ee   :  { %v3183_v16 = vpop.f32.mrf.mxu0 }
 0x1ef   :  { %v2350_v51 = vadd.f32 %v3293_v50, %v2189_v49  ;;  %v3184_v53 = vadd.f32 %v3183_v16, %v3182_v45  ;;  %v3295_v46 = vpop.f32.mrf.mxu1 }
 0x1f0   :  { %v3185_v58 = vpop.f32.mrf.mxu0  ;;  %v3296_v52 = vadd.f32 %v3295_v46, %v3294_v31 }
 0x1f1   :  { %v2408_v48 = vmax.f32 %v2350_v51, 0.0  ;;  %v2194_v57 = vadd.f32 %v3184_v53, %v3989_v9  ;;  %v3297_v59 = vpop.f32.mrf.mxu1 }
 0x1f2   :  { %v3186_v63 = vpop.f32.mrf.mxu0 }
 0x1f3   :  { %v2428_v2 = vpack.c.bf16 %v2408_v48, %v2407_v54  ;;  %v3187_v3 = vadd.f32 %v3186_v63, %v3185_v58  ;;  %v3298_v55 = vpop.f32.mrf.mxu1  ;;  %v2355_v60 = vadd.f32 %v3296_v52, %v2194_v57 }
 0x1f4   :  { %v3188_v37 = vpop.f32.mrf.mxu0  ;;  %v3299_v5 = vadd.f32 %v3298_v55, %v3297_v59 }
 0x1f5   :  { %v2197_v21 = vadd.f32 %v3187_v3, %v3992_v20  ;;  %v3300_v1 = vpop.f32.mrf.mxu1  ;;  %3397 = vmatmul.mubr.bf16.gmra.mxu0 %v2428_v2  ;;  %v2409_v0 = vmax.f32 %v2355_v60, 0.0 }
 0x1f6   :  { %v3189_v4 = vpop.f32.mrf.mxu0 }
 0x1f7   :  { %v2358_v8 = vadd.f32 %v3299_v5, %v2197_v21  ;;  %v3190_v6 = vadd.f32 %v3189_v4, %v3188_v37  ;;  %v3301_v11 = vpop.f32.mrf.mxu1 }
 0x1f8   :  { %v3191_v14 = vpop.f32.mrf.mxu0  ;;  %v3302_v42 = vadd.f32 %v3301_v11, %v3300_v1 }
 0x1f9   :  { %v2410_v9 = vmax.f32 %v2358_v8, 0.0  ;;  %v2202_v7 = vadd.f32 %v3190_v6, %v3995_v33  ;;  %v3303_v17 = vpop.f32.mrf.mxu1 }
 0x1fa   :  { %v3192_v15 = vpop.f32.mrf.mxu0 }
 0x1fb   :  { %v3193_v56 = vadd.f32 %v3192_v15, %v3191_v14  ;;  %v3304_v18 = vpop.f32.mrf.mxu1  ;;  %v2429_v19 = vpack.c.bf16 %v2410_v9, %v2409_v0  ;;  %v2363_v20 = vadd.f32 %v3302_v42, %v2202_v7 }
 0x1fc   :  { %v3194_v22 = vpop.f32.mrf.mxu0  ;;  %v3305_v23 = vadd.f32 %v3304_v18, %v3303_v17 }
 0x1fd   :  { %v2205_v13 = vadd.f32 %v3193_v56, %v3998_v47  ;;  %v3306_v27 = vpop.f32.mrf.mxu1  ;;  %3400 = vmatprep.mubr.bf16.mxu0 %v2429_v19  ;;  %v2411_v12 = vmax.f32 %v2363_v20, 0.0 }
 0x1fe   :  { %v3195_v29 = vpop.f32.mrf.mxu0 }
 0x1ff   :  { %v2366_v28 = vadd.f32 %v3305_v23, %v2205_v13  ;;  %v3196_v25 = vadd.f32 %v3195_v29, %v3194_v22  ;;  %v3307_v30 = vpop.f32.mrf.mxu1 }
 0x200   :  { %v3197_v32 = vpop.f32.mrf.mxu0  ;;  %v3308_v39 = vadd.f32 %v3307_v30, %v3306_v27 }
 0x201   :  { %v2412_v33 = vmax.f32 %v2366_v28, 0.0  ;;  %v2210_v62 = vadd.f32 %v3196_v25, %v4001_v61  ;;  %v3309_v24 = vpop.f32.mrf.mxu1 }
 0x202   :  { %v3198_v34 = vpop.f32.mrf.mxu0 }
 0x203   :  { %v2430_v38 = vpack.c.bf16 %v2412_v33, %v2411_v12  ;;  %v3199_v41 = vadd.f32 %v3198_v34, %v3197_v32  ;;  %v3310_v35 = vpop.f32.mrf.mxu1  ;;  %v2371_v47 = vadd.f32 %v3308_v39, %v2210_v62 }
 0x204   :  { %v3200_v44 = vpop.f32.mrf.mxu0  ;;  %v3311_v45 = vadd.f32 %v3310_v35, %v3309_v24 }
 0x205   :  { %v2213_v43 = vadd.f32 %v3199_v41, %v4004_v10  ;;  %v3312_v36 = vpop.f32.mrf.mxu1  ;;  %3401 = vmatmul.mubr.bf16.gmra.mxu0 %v2430_v38  ;;  %v2413_v53 = vmax.f32 %v2371_v47, 0.0  ;;  %v4074_v38 = vld [vmem:[%s4129_s5] sm:$0x1] }
 0x206   :  { %v3201_v49 = vpop.f32.mrf.mxu0  ;;  %3358 = vmatprep.mubr.bf16.mxu1 %v4074_v38 }
 0x207   :  { %v2374_v50 = vadd.f32 %v3311_v45, %v2213_v43  ;;  %v3202_v31 = vadd.f32 %v3201_v49, %v3200_v44  ;;  %v3313_v16 = vpop.f32.mrf.mxu1 }
 0x208   :  { %v3203_v51 = vpop.f32.mrf.mxu0  ;;  %v3314_v48 = vadd.f32 %v3313_v16, %v3312_v36 }
 0x209   :  { %v2414_v61 = vmax.f32 %v2374_v50, 0.0  ;;  %v2218_v46 = vadd.f32 %v3202_v31, %v4007_v26  ;;  %v3315_v58 = vpop.f32.mrf.mxu1  ;;  %v4047_v26 = vld [vmem:[%s4128_s4] ss:$0 sm:$0xff] }
 0x20a   :  { %v3204_v54 = vpop.f32.mrf.mxu0 }
 0x20b   :  { %v3205_v57 = vadd.f32 %v3204_v54, %v3203_v51  ;;  %v3316_v59 = vpop.f32.mrf.mxu1  ;;  %v2431_v63 = vpack.c.bf16 %v2414_v61, %v2413_v53  ;;  %v2379_v2 = vadd.f32 %v3314_v48, %v2218_v46 }
 0x20c   :  { %v3317_v52 = vadd.f32 %v3316_v59, %v3315_v58 }
 0x20d   :  { %v2221_v10 = vadd.f32 %v3205_v57, %v4010_v40  ;;  %3404 = vmatprep.mubr.bf16.mxu0 %v2431_v63  ;;  %v2415_v55 = vmax.f32 %v2379_v2, 0.0 }
 0x20f   :  { %v2382_v3 = vadd.f32 %v3317_v52, %v2221_v10 }
 0x211   :  { %v2416_v37 = vmax.f32 %v2382_v3, 0.0 }
 0x213   :  { %v2432_v60 = vpack.c.bf16 %v2416_v37, %v2415_v55 }
 0x215   :  { %3405 = vmatmul.mubr.bf16.gmra.mxu0 %v2432_v60 }
 0x265   :  { %v3378_v21 = vpop.f32.mrf.mxu0 }
 0x266   :  { %v2547_v1 = vadd.f32 %v3378_v21, %v4047_v26 }
 0x267   :  { %v2538_v5 = vpop.f32.mrf.mxu0 }
 0x268   :  { %v2539_v8 = vadd.f32 %v4047_v26, %v2538_v5  ;;  %v2667_v11 = vmax.f32 %v2547_v1, 0.0 }
 0x269   :  { %v3379_v4 = vpop.f32.mrf.mxu0 }
 0x26a   :  { %v2550_v40 = vadd.f32 %v3379_v4, %v4047_v26  ;;  %v2665_v9 = vmax.f32 %v2539_v8, 0.0 }
 0x26b   :  { %v2541_v6 = vpop.f32.mrf.mxu0 }
 0x26c   :  { %v2668_v14 = vmax.f32 %v2550_v40, 0.0  ;;  %v2542_v0 = vadd.f32 %v4047_v26, %v2541_v6 }
 0x26e   :  { %v4053_v7 = vpack.c.bf16 %v2668_v14, %v2667_v11  ;;  %v2666_v17 = vmax.f32 %v2542_v0, 0.0 }
 0x270   :  { %v4055_v15 = vpack.c.bf16 %v2666_v17, %v2665_v9 }
 0x275   :  { %v3382_v42 = vpop.f32.mrf.mxu0 }
 0x276   :  { %v2563_v18 = vadd.f32 %v3382_v42, %v4047_v26 }
 0x277   :  { %v2554_v56 = vpop.f32.mrf.mxu0 }
 0x278   :  { %v2555_v22 = vadd.f32 %v4047_v26, %v2554_v56  ;;  %v2671_v23 = vmax.f32 %v2563_v18, 0.0 }
 0x279   :  { %v3383_v19 = vpop.f32.mrf.mxu0 }
 0x27a   :  { %v2566_v20 = vadd.f32 %v3383_v19, %v4047_v26  ;;  %v2669_v28 = vmax.f32 %v2555_v22, 0.0 }
 0x27b   :  { %v2557_v13 = vpop.f32.mrf.mxu0 }
 0x27c   :  { %v2672_v27 = vmax.f32 %v2566_v20, 0.0  ;;  %v2558_v29 = vadd.f32 %v4047_v26, %v2557_v13 }
 0x27e   :  { %v4061_v25 = vpack.c.bf16 %v2672_v27, %v2671_v23  ;;  %v2670_v30 = vmax.f32 %v2558_v29, 0.0 }
 0x280   :  { %v4063_v32 = vpack.c.bf16 %v2670_v30, %v2669_v28 }
 0x285   :  { %v4065_v12 = vpop.f32.mrf.mxu0 }
 0x287   :  { %v4067_v33 = vpop.f32.mrf.mxu0 }
 0x289   :  { %v3387_v62 = vpop.f32.mrf.mxu0 }
 0x28a   :  { %v2582_v30 = vadd.f32 %v3387_v62, %v4047_v26 }
 0x28b   :  { %v4069_v24 = vpop.f32.mrf.mxu0 }
 0x295   :  { %v3390_v34 = vpop.f32.mrf.mxu0 }
 0x296   :  { %v2595_v21 = vadd.f32 %v3390_v34, %v4047_v26 }
 0x297   :  { %v2586_v39 = vpop.f32.mrf.mxu0 }
 0x298   :  { %v2679_v0 = vmax.f32 %v2595_v21, 0.0  ;;  %v2587_v20 = vadd.f32 %v4047_v26, %v2586_v39 }
 0x299   :  { %v3391_v41 = vpop.f32.mrf.mxu0 }
 0x29a   :  { %v2598_v55 = vadd.f32 %v3391_v41, %v4047_v26  ;;  %v2677_v29 = vmax.f32 %v2587_v20, 0.0 }
 0x29b   :  { %v2589_v35 = vpop.f32.mrf.mxu0 }
 0x29c   :  { %v2680_v8 = vmax.f32 %v2598_v55, 0.0  ;;  %v2590_v18 = vadd.f32 %v4047_v26, %v2589_v35 }
 0x29e   :  { %v2705_v56 = vpack.c.bf16 %v2680_v8, %v2679_v0  ;;  %v2678_v23 = vmax.f32 %v2590_v18, 0.0 }
 0x2a0   :  { %v2704_v34 = vpack.c.bf16 %v2678_v23, %v2677_v29 }
 0x2a5   :  { %v3394_v44 = vpop.f32.mrf.mxu0 }
 0x2a6   :  { %v2611_v43 = vadd.f32 %v3394_v44, %v4047_v26  ;;  %v2579_v44 = vadd.f32 %v4065_v12, %v4047_v26 }
 0x2a7   :  { %v2602_v47 = vpop.f32.mrf.mxu0 }
 0x2a8   :  { %v2603_v36 = vadd.f32 %v4047_v26, %v2602_v47  ;;  %v2683_v31 = vmax.f32 %v2611_v43, 0.0  ;;  %v2676_v47 = vmax.f32 %v2582_v30, 0.0 }
 0x2a9   :  { %v3395_v45 = vpop.f32.mrf.mxu0 }
 0x2aa   :  { %v2614_v49 = vadd.f32 %v3395_v45, %v4047_v26  ;;  %v2681_v53 = vmax.f32 %v2603_v36, 0.0  ;;  %v2675_v45 = vmax.f32 %v2579_v44, 0.0 }
 0x2ab   :  { %v2605_v50 = vpop.f32.mrf.mxu0 }
 0x2ac   :  { %v2684_v16 = vmax.f32 %v2614_v49, 0.0  ;;  %v2606_v51 = vadd.f32 %v4047_v26, %v2605_v50  ;;  %v2703_v49 = vpack.c.bf16 %v2676_v47, %v2675_v45  ;;  %v2574_v50 = vadd.f32 %v4047_v26, %v4069_v24 }
 0x2ae   :  { %v4081_v61 = vpack.c.bf16 %v2684_v16, %v2683_v31  ;;  %v2682_v46 = vmax.f32 %v2606_v51, 0.0  ;;  %v2571_v16 = vadd.f32 %v4047_v26, %v4067_v33  ;;  %v2674_v51 = vmax.f32 %v2574_v50, 0.0 }
 0x2b0   :  { %v4083_v58 = vpack.c.bf16 %v2682_v46, %v2681_v53  ;;  %v2673_v46 = vmax.f32 %v2571_v16, 0.0 }
 0x2b5   :  { %v3398_v54 = vpop.f32.mrf.mxu0 }
 0x2b6   :  { %v2627_v12 = vadd.f32 %v3398_v54, %v4047_v26 }
 0x2b7   :  { %v4085_v48 = vpop.f32.mrf.mxu0 }
 0x2b8   :  { %v2619_v24 = vadd.f32 %v4047_v26, %v4085_v48  ;;  %v2763_v48 = vlaneseq }
 0x2b9   :  { %v3399_v57 = vpop.f32.mrf.mxu0 }
 0x2ba   :  { %v2630_v62 = vadd.f32 %v3399_v57, %v4047_v26  ;;  %v2764_v55 = vshrl.u32 %v2763_v48, 7  ;;  %vm2777_vm0 = vcmp.lt.s32.totalorder %v2763_v48, 256 }
 0x2bb   :  { %v2621_v59 = vpop.f32.mrf.mxu0 }
 0x2bc   :  { %v2688_v53 = vmax.f32 %v2630_v62, 0.0 }
 0x2c5   :  { %v3402_v63 = vpop.f32.mrf.mxu0 }
 0x2c6   :  { %v2643_v13 = vadd.f32 %v3402_v63, %v4047_v26  ;;  %v2687_v63 = vmax.f32 %v2627_v12, 0.0 }
 0x2c7   :  { %v2634_v2 = vpop.f32.mrf.mxu0 }
 0x2c8   :  { %v2691_v28 = vmax.f32 %v2643_v13, 0.0  ;;  %v2635_v39 = vadd.f32 %v4047_v26, %v2634_v2  ;;  %v2702_v2 = vpack.c.bf16 %v2674_v51, %v2673_v46 }
 0x2c9   :  { %v3403_v10 = vpop.f32.mrf.mxu0 }
 0x2ca   :  { %v2646_v19 = vadd.f32 %v3403_v10, %v4047_v26  ;;  %v2689_v36 = vmax.f32 %v2635_v39, 0.0  ;;  %v2709_v10 = vpack.c.bf16 %v2688_v53, %v2687_v63 }
 0x2cb   :  { %v2637_v52 = vpop.f32.mrf.mxu0 }
 0x2cc   :  { %v2692_v27 = vmax.f32 %v2646_v19, 0.0  ;;  %v2638_v35 = vadd.f32 %v4047_v26, %v2637_v52  ;;  %v2622_v52 = vadd.f32 %v4047_v26, %v2621_v59 }
 0x2ce   :  { %v2711_v41 = vpack.c.bf16 %v2692_v27, %v2691_v28  ;;  %v2690_v43 = vmax.f32 %v2638_v35, 0.0  ;;  %v2686_v57 = vmax.f32 %v2622_v52, 0.0 }
 0x2d0   :  { %v2710_v31 = vpack.c.bf16 %v2690_v43, %v2689_v36 }
 0x2d5   :  { %v3406_v3 = vpop.f32.mrf.mxu0 }
 0x2d6   :  { %v2659_v60 = vadd.f32 %v3406_v3, %v4047_v26  ;;  %v2685_v3 = vmax.f32 %v2619_v24, 0.0 }
 0x2d7   :  { %v2650_v37 = vpop.f32.mrf.mxu0 }
 0x2d8   :  { %v2651_v1 = vadd.f32 %v4047_v26, %v2650_v37  ;;  %v2695_v6 = vmax.f32 %v2659_v60, 0.0  ;;  %v2708_v33 = vpack.c.bf16 %v2686_v57, %v2685_v3 }
 0x2d9   :  { %v3407_v5 = vpop.f32.mrf.mxu0 }
 0x2da   :  { %v2662_v4 = vadd.f32 %v3407_v5, %v4047_v26  ;;  %v2693_v9 = vmax.f32 %v2651_v1, 0.0 }
 0x2db   :  { %v2653_v40 = vpop.f32.mrf.mxu0 }
 0x2dc   :  { %v2696_v11 = vmax.f32 %v2662_v4, 0.0  ;;  %v2654_v14 = vadd.f32 %v4047_v26, %v2653_v40  ;;  %v3582_v26 = vmov 1966171168  }
 0x2dd   :  { %v2761_v54 = vunpack.c.l.s4 %v3582_v26 }
 0x2de   :  { %v2713_v17 = vpack.c.bf16 %v2696_v11, %v2695_v6  ;;  %v2694_v42 = vmax.f32 %v2654_v14, 0.0 }
 0x2df   :  { %v2762_v59 = vunpack.c.0.s8 %v2761_v54 }
 0x2e0   :  { %v2712_v22 = vpack.c.bf16 %v2694_v42, %v2693_v9  ;;  %3342 = vmatprep.subr.bf16.mxu1 %v2713_v17 }
 0x2e1   :  { %3343 = vmatpush3.bf16.xpose.msra.mxu1 %v2705_v56 }
 0x2e2   :  { %3344 = vmatprep.subr.bf16.mxu1 %v2712_v22 }
 0x2e9   :  { %3345 = vmatpush3.bf16.xpose.msra.mxu1 %v2704_v34 }
 0x2ea   :  { %3346 = vmatprep.subr.bf16.mxu1 %v2711_v41 }
 0x2f1   :  { %3347 = vmatpush3.bf16.xpose.msra.mxu1 %v2703_v49 }
 0x2f2   :  { %3348 = vmatprep.subr.bf16.mxu1 %v2710_v31 }
 0x2f9   :  { %3349 = vmatpush3.bf16.xpose.msra.mxu1 %v2702_v2 }
 0x2fa   :  { %3350 = vmatprep.subr.bf16.mxu1 %v2709_v10 }
 0x301   :  { %3351 = vmatpush3.bf16.xpose.msra.mxu1 %v4061_v25  ;;  %v2715_v25 = vstv %s4130_s6 }
 0x302   :  { %3352 = vmatprep.subr.bf16.mxu1 %v2708_v33 }
 0x309   :  { %3353 = vmatpush3.bf16.xpose.msra.mxu1 %v4063_v32 }
 0x30a   :  { %3354 = vmatprep.subr.bf16.mxu1 %v4081_v61 }
 0x311   :  { %3355 = vmatpush3.bf16.xpose.msra.mxu1 %v4053_v7  ;;  %v2765_v7 = vsub.s32 %v2762_v59, %v2764_v55 }
 0x312   :  { %3356 = vmatprep.subr.bf16.mxu1 %v4083_v58 }
 0x319   :  { %3357 = vmatpush3.bf16.xpose.msra.mxu1 %v4055_v15 }
 0x320   :  { %3359 = vmatmul.mubr.bf16.vlgmr.msra.gmra.mxu1 %v4074_v38 }
 0x3e0   :  { %v2750_v32 = vpop.f32.mrf.mxu1 }
 0x3e1   :  { %v2751_v61 = vadd.f32 %v2750_v32, %v2715_v25 }
 0x3e2   :  { %v2752_v37 = vpop.f32.mrf.mxu1 }
 0x3e3   :  { %v2753_v60 = vadd.f32 %v2752_v37, %v2715_v25 }
 0x3e4   :  { %v2754_v21 = vpop.f32.mrf.mxu1 }
 0x3e5   :  { %v2759_v58 = vcombine.low %v2751_v61, %v2753_v60 }
 0x3e6   :  { %v2755_v5 = vpop.f32.mrf.mxu1 }
 0x3e7   :  { %v2766_v15 = vrot.slane %v2759_v58, %v2765_v7 }
 0x3e9   :  { %v2773_v38 = vrot.slane %v2766_v15, %v2765_v7 }
 0x3eb   :  { %2779 = vst.msk [vmem:[#allocation9] sm:$0x3] %vm2777_vm0, %v2773_v38 }
 0x3ec   :  { %3560 = shalt.err (!%p3557_p5)
}
 0x3ed   :  { %2789 = dma.vmem_to_hbm [thread:$0]  %s2787_s24, 32, %s4131_s7, [#allocation5]  }
 0x3ee   :  { %3573 = dma.done.wait [#allocation5], 32  }
 0x3ef   :  { %3574 = vsyncadd [#allocation5], 4294967264 }
 0x3f0   :  { %2793 = vsyncpa [#allocation4], 1 }
 0x3f1   :  { %2794 = vsyncpa [#allocation7], 1 }
 0x3f2   :  { %2795 = vsyncpa [#allocation5], 1 }

</bundles_post_ra>
